<compile_context>
chip_gen: v7x
topology: tpu7x:2x2x1
jax: 0.10.0
libtpu: 0.0.40
codegen_flags: <defaults>
</compile_context>

<pallas_src>
import functools

import jax
import jax.numpy as jnp
from jax import lax
from jax.experimental import pallas as pl
from jax.experimental.pallas import tpu as pltpu


DTYPE = jnp.bfloat16          # weight / activation dtype (MXU-native)
RMS_EPS = 1e-5                # LLaMA-family rms_norm_eps
NEG_INF = -1e30
VMEM_LIMIT = 48 * 1024 * 1024 # fits v7x (64 MiB phys) and raises v5e/v6e default


def _cparams(sems):
    return pltpu.CompilerParams(dimension_semantics=sems,
                                vmem_limit_bytes=VMEM_LIMIT)


def _pick(dim, pref, align):
    """Largest tile <= pref that is align-multiple and divides dim, else full dim."""
    if dim <= pref:
        return dim
    t = (pref // align) * align
    while t >= align:
        if dim % t == 0:
            return t
        t -= align
    return dim


# ----------------------------- Pallas kernels -------------------------------

def _linear_kernel(x_ref, w_ref, o_ref, acc_ref):
    # grid = (M/tm, N/tn, K/tk); K is the reduction axis (last, "arbitrary").
    @pl.when(pl.program_id(2) == 0)
    def _():
        acc_ref[...] = jnp.zeros_like(acc_ref)

    acc_ref[...] += jnp.dot(x_ref[...], w_ref[...],
                            preferred_element_type=jnp.float32)

    @pl.when(pl.program_id(2) == pl.num_programs(2) - 1)
    def _():
        o_ref[...] = acc_ref[...].astype(o_ref.dtype)


def _linear_bias_kernel(x_ref, w_ref, b_ref, o_ref, acc_ref):
    @pl.when(pl.program_id(2) == 0)
    def _():
        acc_ref[...] = jnp.zeros_like(acc_ref)

    acc_ref[...] += jnp.dot(x_ref[...], w_ref[...],
                            preferred_element_type=jnp.float32)

    @pl.when(pl.program_id(2) == pl.num_programs(2) - 1)
    def _():
        o_ref[...] = (acc_ref[...] + b_ref[...].astype(jnp.float32)
                      ).astype(o_ref.dtype)


def _norm_linear_kernel(x_ref, g_ref, w_ref, o_ref, *, eps):
    # Fused RMSNorm(x) @ W   -- K kept whole (fits VMEM for H up to ~8k bf16).
    x = x_ref[...].astype(jnp.float32)
    var = jnp.mean(x * x, axis=-1, keepdims=True)
    xn = (x * lax.rsqrt(var + eps) * g_ref[...].astype(jnp.float32)
          ).astype(w_ref.dtype)
    o_ref[...] = jnp.dot(xn, w_ref[...],
                         preferred_element_type=jnp.float32).astype(o_ref.dtype)


def _residual_linear_kernel(x_ref, w_ref, r_ref, o_ref):
    # Fused  residual + x @ W   (attention output projection epilogue).
    acc = jnp.dot(x_ref[...], w_ref[...], preferred_element_type=jnp.float32)
    o_ref[...] = (r_ref[...].astype(jnp.float32) + acc).astype(o_ref.dtype)


def _mlp_kernel(x_ref, g_ref, wg_ref, wu_ref, wd_ref, o_ref, acc_ref, *, eps):
    # Fused  x + SwiGLU(RMSNorm(x)) @ Wd, tiled over the intermediate dim (reduction).
    l = pl.program_id(1)
    x = x_ref[...].astype(jnp.float32)

    @pl.when(l == 0)
    def _():
        acc_ref[...] = x                     # residual init

    var = jnp.mean(x * x, axis=-1, keepdims=True)
    xn = (x * lax.rsqrt(var + eps) * g_ref[...].astype(jnp.float32)
          ).astype(wg_ref.dtype)
    g = jnp.dot(xn, wg_ref[...], preferred_element_type=jnp.float32)
    u = jnp.dot(xn, wu_ref[...], preferred_element_type=jnp.float32)
    h = (g * jax.nn.sigmoid(g) * u).astype(wd_ref.dtype)
    acc_ref[...] += jnp.dot(h, wd_ref[...], preferred_element_type=jnp.float32)

    @pl.when(l == pl.num_programs(1) - 1)
    def _():
        o_ref[...] = acc_ref[...].astype(o_ref.dtype)


def _rmsnorm_kernel(x_ref, g_ref, o_ref, *, eps):
    x = x_ref[...].astype(jnp.float32)
    var = jnp.mean(x * x, axis=-1, keepdims=True)
    o_ref[...] = (x * lax.rsqrt(var + eps) * g_ref[...].astype(jnp.float32)
                  ).astype(o_ref.dtype)


def _flash_attn_kernel(q_ref, k_ref, v_ref, o_ref, m_sc, l_sc, acc_sc, *, scale):
    # grid = (heads, S/tq, S/tk); kv axis last ("arbitrary") with online softmax.
    qi = pl.program_id(1)
    ki = pl.program_id(2)
    tq = q_ref.shape[1]
    tk = k_ref.shape[1]

    @pl.when(ki == 0)
    def _():
        m_sc[...] = jnp.full_like(m_sc, NEG_INF)
        l_sc[...] = jnp.zeros_like(l_sc)
        acc_sc[...] = jnp.zeros_like(acc_sc)

    # Skip kv blocks that are entirely in the causal future of this q block.
    @pl.when(ki * tk <= qi * tq + (tq - 1))
    def _():
        q = q_ref[0]
        k = k_ref[0]
        s = lax.dot_general(q, k, (((1,), (1,)), ((), ())),
                            preferred_element_type=jnp.float32) * scale   # [tq, tk]
        row = qi * tq + lax.broadcasted_iota(jnp.int32, (tq, tk), 0)
        col = ki * tk + lax.broadcasted_iota(jnp.int32, (tq, tk), 1)
        s = jnp.where(col <= row, s, NEG_INF)

        m_prev = m_sc[...]
        m_new = jnp.maximum(m_prev, jnp.max(s, axis=-1, keepdims=True))
        alpha = jnp.exp(m_prev - m_new)
        p = jnp.exp(s - m_new)
        l_sc[...] = alpha * l_sc[...] + jnp.sum(p, axis=-1, keepdims=True)
        acc_sc[...] = alpha * acc_sc[...] + jnp.dot(
            p.astype(v_ref.dtype), v_ref[0], preferred_element_type=jnp.float32)
        m_sc[...] = m_new

    @pl.when(ki == pl.num_programs(2) - 1)
    def _():
        o_ref[0] = (acc_sc[...] * pl.reciprocal(l_sc[...], approx=True)
                    ).astype(o_ref.dtype)


# ------------------------------- wrappers ------------------------------------

def linear(x, w, b=None, *, tm=256, tn=512, tk=1024):
    """x: [M, K] @ w: [K, N] (+ optional b: [N]) -> [M, N], K/N/M tiled."""
    M, K = x.shape
    N = w.shape[1]
    tm = _pick(M, tm, 8)
    tn = _pick(N, tn, 128)
    tk = _pick(K, tk, 128)
    grid = (M // tm, N // tn, K // tk)
    x_spec = pl.BlockSpec((tm, tk), lambda i, j, k: (i, k))
    w_spec = pl.BlockSpec((tk, tn), lambda i, j, k: (k, j))
    o_spec = pl.BlockSpec((tm, tn), lambda i, j, k: (i, j))
    scratch = [pltpu.VMEM((tm, tn), jnp.float32)]
    if b is None:
        return pl.pallas_call(
            _linear_kernel,
            out_shape=jax.ShapeDtypeStruct((M, N), x.dtype),
            grid_spec=pltpu.PrefetchScalarGridSpec(
                num_scalar_prefetch=0, grid=grid,
                in_specs=[x_spec, w_spec], out_specs=o_spec,
                scratch_shapes=scratch),
            compiler_params=_cparams(("parallel", "parallel", "arbitrary")),
        )(x, w)
    b_spec = pl.BlockSpec((1, tn), lambda i, j, k: (0, j))
    return pl.pallas_call(
        _linear_bias_kernel,
        out_shape=jax.ShapeDtypeStruct((M, N), x.dtype),
        grid_spec=pltpu.PrefetchScalarGridSpec(
            num_scalar_prefetch=0, grid=grid,
            in_specs=[x_spec, w_spec, b_spec], out_specs=o_spec,
            scratch_shapes=scratch),
        compiler_params=_cparams(("parallel", "parallel", "arbitrary")),
    )(x, w, b.reshape(1, N))


def norm_linear(x, gamma, w, *, tm=256, tn=512):
    """RMSNorm(x, gamma) @ w, fused in one kernel. x: [M, K], w: [K, N]."""
    M, K = x.shape
    N = w.shape[1]
    tm = _pick(M, tm, 8)
    tn = _pick(N, tn, 128)
    return pl.pallas_call(
        functools.partial(_norm_linear_kernel, eps=RMS_EPS),
        out_shape=jax.ShapeDtypeStruct((M, N), x.dtype),
        grid_spec=pltpu.PrefetchScalarGridSpec(
            num_scalar_prefetch=0, grid=(M // tm, N // tn),
            in_specs=[pl.BlockSpec((tm, K), lambda i, j: (i, 0)),
                      pl.BlockSpec((1, K), lambda i, j: (0, 0)),
                      pl.BlockSpec((K, tn), lambda i, j: (0, j))],
            out_specs=pl.BlockSpec((tm, tn), lambda i, j: (i, j))),
        compiler_params=_cparams(("parallel", "parallel")),
    )(x, gamma.reshape(1, K), w)


def residual_linear(x, w, residual, *, tm=256, tn=512):
    """residual + x @ w, fused. x: [M, K], w: [K, N], residual: [M, N]."""
    M, K = x.shape
    N = w.shape[1]
    tm = _pick(M, tm, 8)
    tn = _pick(N, tn, 128)
    return pl.pallas_call(
        _residual_linear_kernel,
        out_shape=jax.ShapeDtypeStruct((M, N), residual.dtype),
        grid_spec=pltpu.PrefetchScalarGridSpec(
            num_scalar_prefetch=0, grid=(M // tm, N // tn),
            in_specs=[pl.BlockSpec((tm, K), lambda i, j: (i, 0)),
                      pl.BlockSpec((K, tn), lambda i, j: (0, j)),
                      pl.BlockSpec((tm, tn), lambda i, j: (i, j))],
            out_specs=pl.BlockSpec((tm, tn), lambda i, j: (i, j))),
        compiler_params=_cparams(("parallel", "parallel")),
    )(x, w, residual)


def fused_mlp(x, gamma, wg, wu, wd, *, tm=256, ti=512):
    """x + SwiGLU(RMSNorm(x)) projected back to H; tiled over intermediate dim."""
    M, H = x.shape
    I = wg.shape[1]
    tm = _pick(M, tm, 8)
    ti = _pick(I, ti, 128)
    return pl.pallas_call(
        functools.partial(_mlp_kernel, eps=RMS_EPS),
        out_shape=jax.ShapeDtypeStruct((M, H), x.dtype),
        grid_spec=pltpu.PrefetchScalarGridSpec(
            num_scalar_prefetch=0, grid=(M // tm, I // ti),
            in_specs=[pl.BlockSpec((tm, H), lambda i, l: (i, 0)),
                      pl.BlockSpec((1, H), lambda i, l: (0, 0)),
                      pl.BlockSpec((H, ti), lambda i, l: (0, l)),
                      pl.BlockSpec((H, ti), lambda i, l: (0, l)),
                      pl.BlockSpec((ti, H), lambda i, l: (l, 0))],
            out_specs=pl.BlockSpec((tm, H), lambda i, l: (i, 0)),
            scratch_shapes=[pltpu.VMEM((tm, H), jnp.float32)]),
        compiler_params=_cparams(("parallel", "arbitrary")),
    )(x, gamma.reshape(1, H), wg, wu, wd)


def rmsnorm(x, gamma, *, tm=256):
    M, H = x.shape
    tm = _pick(M, tm, 8)
    return pl.pallas_call(
        functools.partial(_rmsnorm_kernel, eps=RMS_EPS),
        out_shape=jax.ShapeDtypeStruct((M, H), x.dtype),
        grid_spec=pltpu.PrefetchScalarGridSpec(
            num_scalar_prefetch=0, grid=(M // tm,),
            in_specs=[pl.BlockSpec((tm, H), lambda i: (i, 0)),
                      pl.BlockSpec((1, H), lambda i: (0, 0))],
            out_specs=pl.BlockSpec((tm, H), lambda i: (i, 0))),
        compiler_params=_cparams(("parallel",)),
    )(x, gamma.reshape(1, H))


def flash_attention(q, k, v, *, tq=256, tkv=512):
    """q, k, v: [nH, S, D] -> [nH, S, D], causal flash attention per head."""
    nH, S, D = q.shape
    tq = _pick(S, tq, 8)
    tkv = _pick(S, tkv, 8)
    scale = 1.0 / (D ** 0.5)
    return pl.pallas_call(
        functools.partial(_flash_attn_kernel, scale=scale),
        out_shape=jax.ShapeDtypeStruct((nH, S, D), q.dtype),
        grid_spec=pltpu.PrefetchScalarGridSpec(
            num_scalar_prefetch=0, grid=(nH, S // tq, S // tkv),
            in_specs=[pl.BlockSpec((1, tq, D), lambda h, i, j: (h, i, 0)),
                      pl.BlockSpec((1, tkv, D), lambda h, i, j: (h, j, 0)),
                      pl.BlockSpec((1, tkv, D), lambda h, i, j: (h, j, 0))],
            out_specs=pl.BlockSpec((1, tq, D), lambda h, i, j: (h, i, 0)),
            scratch_shapes=[pltpu.VMEM((tq, 1), jnp.float32),
                            pltpu.VMEM((tq, 1), jnp.float32),
                            pltpu.VMEM((tq, D), jnp.float32)]),
        compiler_params=_cparams(("parallel", "parallel", "arbitrary")),
    )(q, k, v)


# ------------------------------ model glue -----------------------------------

def rope_tables(S, D):
    half = D // 2
    inv = 1.0 / (10000.0 ** (jnp.arange(half, dtype=jnp.float32) / half))
    ang = jnp.arange(S, dtype=jnp.float32)[:, None] * inv[None, :]   # [S, half]
    return jnp.cos(ang)[None], jnp.sin(ang)[None]                    # [1, S, half]


def apply_rope(x, cos, sin):
    # TODO(synk): fuse the rotation into the flash-attention kernel (XLU roll);
    #             kept in JAX glue here for lowering robustness at small head dims.
    half = x.shape[-1] // 2
    xf = x.astype(jnp.float32)
    x1, x2 = xf[..., :half], xf[..., half:]
    return jnp.concatenate([x1 * cos - x2 * sin, x2 * cos + x1 * sin],
                           axis=-1).astype(x.dtype)


def decoder_layer(x, p, cos, sin, num_heads):
    """LLaMA-style decoder layer on [S, H] with fused kernels."""
    S, H = x.shape
    D = H // num_heads
    qkv = norm_linear(x, p["ln1"], p["wqkv"])                # RMSNorm + fused QKV
    q, k, v = jnp.split(qkv, 3, axis=-1)
    q = q.reshape(S, num_heads, D).transpose(1, 0, 2)
    k = k.reshape(S, num_heads, D).transpose(1, 0, 2)
    v = v.reshape(S, num_heads, D).transpose(1, 0, 2)
    q = apply_rope(q, cos, sin)
    k = apply_rope(k, cos, sin)
    a = flash_attention(q, k, v)                             # [nH, S, D]
    a = a.transpose(1, 0, 2).reshape(S, H)
    x = residual_linear(a, p["wo"], x)                       # x + a @ Wo
    return fused_mlp(x, p["ln2"], p["wg"], p["wu"], p["wd"])  # x + swiglu(rms(x))


@functools.partial(jax.jit, static_argnames=("num_heads", "top_k"))
def ea_model_forward(params, input_ids, *, num_heads, top_k):
    """EaModel.forward(input_ids, init=True, output_orig=True, logits_processor=None).

    input_ids: [1, S] int32 (batch 1, matching the torch.argmax flatten semantics).
    Returns ((topk_ids, topk_probs), orig, hidden_states, token).
    """
    S = input_ids.shape[1]
    H = params["embed"].shape[1]
    D = H // num_heads
    cos, sin = rope_tables(S, D)

    # ---- base_model.model ----
    x = params["embed"][input_ids[0]]                                  # [S, H]
    for lp in params["base_layers"]:
        x = decoder_layer(x, lp, cos, sin, num_heads)
    hidden_states = rmsnorm(x, params["final_norm"])                   # outputs[0]

    # ---- base_model.lm_head ----
    orig = linear(hidden_states, params["lm_head"])                    # [S, V]

    # ---- init branch (greedy): token = argmax(orig[:, -1]) flattened ----
    # TODO(synk): logits_processor / multinomial sampling path not implemented.
    token = jnp.argmax(orig[-1].astype(jnp.float32)).reshape(1, 1)
    token = token.astype(input_ids.dtype)                              # [1, 1]
    input_ids_ext = jnp.concatenate([input_ids, token], axis=1)        # [1, S+1]

    # ---- ea_layer.topK_genrate (single draft step) ----
    # TODO(synk): full multi-step tree expansion (topK_genrate tree) not reproduced;
    #             a single EAGLE draft step with top-K heads is implemented.
    draft_emb = params["embed"][input_ids_ext[0, 1:]]                  # [S, H]
    fc_in = jnp.concatenate([draft_emb, hidden_states], axis=-1)       # [S, 2H]
    ea_h = linear(fc_in, params["ea_fc_w"], params["ea_fc_b"])         # [S, H]
    ea_h = decoder_layer(ea_h, params["ea_layer"], cos, sin, num_heads)
    ea_logits = linear(ea_h[-1:], params["lm_head"])                   # [1, V]
    topk_vals, topk_ids = lax.top_k(ea_logits[0].astype(jnp.float32), top_k)
    topk_probs = jax.nn.softmax(topk_vals)

    return ((topk_ids[None], topk_probs[None]),
            orig[None],                                                # [1, S, V]
            hidden_states[None],                                       # [1, S, H]
            token)


# --------------------------- parameter construction --------------------------

def make_layer_params(key, H, I, dtype):
    ks = jax.random.split(key, 5)
    s = 0.05
    return {
        "wqkv": (jax.random.normal(ks[0], (H, 3 * H), jnp.float32) * s).astype(dtype),
        "wo":   (jax.random.normal(ks[1], (H, H), jnp.float32) * s).astype(dtype),
        "wg":   (jax.random.normal(ks[2], (H, I), jnp.float32) * s).astype(dtype),
        "wu":   (jax.random.normal(ks[3], (H, I), jnp.float32) * s).astype(dtype),
        "wd":   (jax.random.normal(ks[4], (I, H), jnp.float32) * s).astype(dtype),
        "ln1": jnp.ones((H,), jnp.float32),
        "ln2": jnp.ones((H,), jnp.float32),
    }


def make_params(key, *, vocab=128, hidden=32, intermediate=64, num_layers=2,
                dtype=DTYPE):
    keys = jax.random.split(key, num_layers + 4)
    return {
        "embed": (jax.random.normal(keys[0], (vocab, hidden), jnp.float32)
                  * 0.05).astype(dtype),
        "lm_head": (jax.random.normal(keys[1], (hidden, vocab), jnp.float32)
                    * 0.05).astype(dtype),
        "final_norm": jnp.ones((hidden,), jnp.float32),
        "base_layers": [make_layer_params(keys[2 + i], hidden, intermediate, dtype)
                        for i in range(num_layers)],
        "ea_fc_w": (jax.random.normal(keys[2 + num_layers], (2 * hidden, hidden),
                                      jnp.float32) * 0.05).astype(dtype),
        "ea_fc_b": jnp.zeros((hidden,), jnp.float32),
        "ea_layer": make_layer_params(keys[3 + num_layers], hidden, intermediate,
                                      dtype),
    }


# ----------------------------------- main ------------------------------------

if __name__ == "__main__":
    key = jax.random.PRNGKey(0)
    k_par, k_ids = jax.random.split(key)

    VOCAB, HIDDEN, HEADS, INTER, LAYERS, SEQ, TOPK = 128, 32, 4, 64, 2, 8, 8
    params = make_params(k_par, vocab=VOCAB, hidden=HIDDEN,
                         intermediate=INTER, num_layers=LAYERS)

    input_ids = jax.random.randint(k_ids, (1, SEQ), 0, VOCAB, dtype=jnp.int32)

    (topk_ids, topk_probs), orig, hidden_states, token = ea_model_forward(
        params, input_ids, num_heads=HEADS, top_k=TOPK)
    jax.block_until_ready((topk_ids, topk_probs, orig, hidden_states, token))

    assert topk_ids.shape == (1, TOPK)
    assert topk_probs.shape == (1, TOPK)
    assert orig.shape == (1, SEQ, VOCAB)
    assert hidden_states.shape == (1, SEQ, HIDDEN)
    assert token.shape == (1, 1)

    print("KERNEL_OK")
</pallas_src>

<mosaic_0001>
module attributes {stable_mosaic.version = 11 : i64} {
  func.func @_norm_linear_kernel(%arg0: i32, %arg1: i32, %arg2: memref<8x32xbf16, #tpu.memory_space<vmem>>, %arg3: memref<1x32xf32, #tpu.memory_space<vmem>>, %arg4: memref<32x96xbf16, #tpu.memory_space<vmem>>, %arg5: memref<8x96xbf16, #tpu.memory_space<vmem>>) attributes {dimension_semantics = [#tpu.dimension_semantics<parallel>, #tpu.dimension_semantics<parallel>], iteration_bounds = array<i64: 1, 1>, scalar_prefetch = 0 : i64, scratch_operands = 0 : i64, tpu.core_type = #tpu.core_type<tc>, window_params = [{transform_indices = @transform_0, window_bounds = array<i64: 8, 32>}, {pipeline_mode = #tpu.pipeline_mode<synchronous>, transform_indices = @transform_1, window_bounds = array<i64: 1, 32>}, {transform_indices = @transform_2, window_bounds = array<i64: 32, 96>}, {transform_indices = @transform_3, window_bounds = array<i64: 8, 96>}]} {
    %c0 = arith.constant 0 : index
    %c0_0 = arith.constant 0 : index
    %0 = vector.load %arg2[%c0, %c0_0] : memref<8x32xbf16, #tpu.memory_space<vmem>>, vector<8x32xbf16>
    %1 = arith.extf %0 : vector<8x32xbf16> to vector<8x32xf32>
    %2 = arith.mulf %1, %1 : vector<8x32xf32>
    %cst = arith.constant dense<0.000000e+00> : vector<8xf32>
    %3 = vector.multi_reduction <add>, %2, %cst [1] : vector<8x32xf32> to vector<8xf32>
    %4 = vector.shape_cast %3 : vector<8xf32> to vector<8x1xf32>
    %cst_1 = arith.constant 3.200000e+01 : f32
    %5 = vector.broadcast %cst_1 : f32 to vector<8x1xf32>
    %6 = arith.divf %4, %5 : vector<8x1xf32>
    %cst_2 = arith.constant 9.99999974E-6 : f32
    %7 = vector.broadcast %cst_2 : f32 to vector<8x1xf32>
    %8 = arith.addf %6, %7 : vector<8x1xf32>
    %9 = math.rsqrt %8 : vector<8x1xf32>
    %10 = vector.broadcast %9 : vector<8x1xf32> to vector<8x32xf32>
    %11 = arith.mulf %1, %10 : vector<8x32xf32>
    %c0_3 = arith.constant 0 : index
    %c0_4 = arith.constant 0 : index
    %12 = vector.load %arg3[%c0_3, %c0_4] : memref<1x32xf32, #tpu.memory_space<vmem>>, vector<1x32xf32>
    %13 = vector.broadcast %12 : vector<1x32xf32> to vector<8x32xf32>
    %14 = arith.mulf %11, %13 : vector<8x32xf32>
    %15 = arith.truncf %14 : vector<8x32xf32> to vector<8x32xbf16>
    %c0_5 = arith.constant 0 : index
    %c0_6 = arith.constant 0 : index
    %16 = vector.load %arg4[%c0_5, %c0_6] : memref<32x96xbf16, #tpu.memory_space<vmem>>, vector<32x96xbf16>
    %cst_7 = arith.constant dense<0.000000e+00> : vector<8x96xf32>
    %17 = tpu.matmul %15, %16, %cst_7 {dimension_numbers = #tpu.dot_dimension_numbers<[1], [0], [0], [1], [0, 0, 1, 1], [], []>} : vector<8x32xbf16>, vector<32x96xbf16>, vector<8x96xf32> -> vector<8x96xf32>
    %18 = arith.truncf %17 : vector<8x96xf32> to vector<8x96xbf16>
    %c0_8 = arith.constant 0 : index
    %c0_9 = arith.constant 0 : index
    %19 = vector.load %arg5[%c0_8, %c0_9] : memref<8x96xbf16, #tpu.memory_space<vmem>>, vector<8x96xbf16>
    tpu.vector_store %arg5[%c0_8, %c0_9], %18 {strides = array<i32>} : memref<8x96xbf16, #tpu.memory_space<vmem>>, vector<8x96xbf16>,
    return
  }
  func.func @transform_0(%arg0: i32, %arg1: i32) -> (i32, i32) {
    %c0_i32 = arith.constant 0 : i32
    %c0_i32_0 = arith.constant 0 : i32
    return %arg0, %c0_i32 : i32, i32
  }
  func.func @transform_1(%arg0: i32, %arg1: i32) -> (i32, i32) {
    %c0_i32 = arith.constant 0 : i32
    %c0_i32_0 = arith.constant 0 : i32
    %c0_i32_1 = arith.constant 0 : i32
    return %c0_i32, %c0_i32_0 : i32, i32
  }
  func.func @transform_2(%arg0: i32, %arg1: i32) -> (i32, i32) {
    %c0_i32 = arith.constant 0 : i32
    %c0_i32_0 = arith.constant 0 : i32
    return %c0_i32, %arg1 : i32, i32
  }
  func.func @transform_3(%arg0: i32, %arg1: i32) -> (i32, i32) {
    %c0_i32 = arith.constant 0 : i32
    return %arg0, %arg1 : i32, i32
  }
}

module attributes {stable_mosaic.version = 11 : i64} {
  func.func @_residual_linear_kernel(%arg0: i32, %arg1: i32, %arg2: memref<8x32xbf16, #tpu.memory_space<vmem>>, %arg3: memref<32x32xbf16, #tpu.memory_space<vmem>>, %arg4: memref<8x32xbf16, #tpu.memory_space<vmem>>, %arg5: memref<8x32xbf16, #tpu.memory_space<vmem>>) attributes {dimension_semantics = [#tpu.dimension_semantics<parallel>, #tpu.dimension_semantics<parallel>], iteration_bounds = array<i64: 1, 1>, scalar_prefetch = 0 : i64, scratch_operands = 0 : i64, tpu.core_type = #tpu.core_type<tc>, window_params = [{transform_indices = @transform_0, window_bounds = array<i64: 8, 32>}, {transform_indices = @transform_1, window_bounds = array<i64: 32, 32>}, {transform_indices = @transform_2, window_bounds = array<i64: 8, 32>}, {transform_indices = @transform_3, window_bounds = array<i64: 8, 32>}]} {
    %c0 = arith.constant 0 : index
    %c0_0 = arith.constant 0 : index
    %0 = vector.load %arg2[%c0, %c0_0] : memref<8x32xbf16, #tpu.memory_space<vmem>>, vector<8x32xbf16>
    %c0_1 = arith.constant 0 : index
    %c0_2 = arith.constant 0 : index
    %1 = vector.load %arg3[%c0_1, %c0_2] : memref<32x32xbf16, #tpu.memory_space<vmem>>, vector<32x32xbf16>
    %cst = arith.constant dense<0.000000e+00> : vector<8x32xf32>
    %2 = tpu.matmul %0, %1, %cst {dimension_numbers = #tpu.dot_dimension_numbers<[1], [0], [0], [1], [0, 0, 1, 1], [], []>} : vector<8x32xbf16>, vector<32x32xbf16>, vector<8x32xf32> -> vector<8x32xf32>
    %c0_3 = arith.constant 0 : index
    %c0_4 = arith.constant 0 : index
    %3 = vector.load %arg4[%c0_3, %c0_4] : memref<8x32xbf16, #tpu.memory_space<vmem>>, vector<8x32xbf16>
    %4 = arith.extf %3 : vector<8x32xbf16> to vector<8x32xf32>
    %5 = arith.addf %4, %2 : vector<8x32xf32>
    %6 = arith.truncf %5 : vector<8x32xf32> to vector<8x32xbf16>
    %c0_5 = arith.constant 0 : index
    %c0_6 = arith.constant 0 : index
    %7 = vector.load %arg5[%c0_5, %c0_6] : memref<8x32xbf16, #tpu.memory_space<vmem>>, vector<8x32xbf16>
    tpu.vector_store %arg5[%c0_5, %c0_6], %6 {strides = array<i32>} : memref<8x32xbf16, #tpu.memory_space<vmem>>, vector<8x32xbf16>,
    return
  }
  func.func @transform_0(%arg0: i32, %arg1: i32) -> (i32, i32) {
    %c0_i32 = arith.constant 0 : i32
    %c0_i32_0 = arith.constant 0 : i32
    return %arg0, %c0_i32 : i32, i32
  }
  func.func @transform_1(%arg0: i32, %arg1: i32) -> (i32, i32) {
    %c0_i32 = arith.constant 0 : i32
    %c0_i32_0 = arith.constant 0 : i32
    return %c0_i32, %arg1 : i32, i32
  }
  func.func @transform_2(%arg0: i32, %arg1: i32) -> (i32, i32) {
    %c0_i32 = arith.constant 0 : i32
    return %arg0, %arg1 : i32, i32
  }
  func.func @transform_3(%arg0: i32, %arg1: i32) -> (i32, i32) {
    %c0_i32 = arith.constant 0 : i32
    return %arg0, %arg1 : i32, i32
  }
}

module attributes {stable_mosaic.version = 11 : i64} {
  func.func @_flash_attn_kernel(%arg0: i32, %arg1: i32, %arg2: i32, %arg3: memref<1x8x8xbf16, #tpu.memory_space<vmem>>, %arg4: memref<1x8x8xbf16, #tpu.memory_space<vmem>>, %arg5: memref<1x8x8xbf16, #tpu.memory_space<vmem>>, %arg6: memref<1x8x8xbf16, #tpu.memory_space<vmem>>, %arg7: memref<8x1xf32, #tpu.memory_space<vmem>>, %arg8: memref<8x1xf32, #tpu.memory_space<vmem>>, %arg9: memref<8x8xf32, #tpu.memory_space<vmem>>) attributes {dimension_semantics = [#tpu.dimension_semantics<parallel>, #tpu.dimension_semantics<parallel>, #tpu.dimension_semantics<arbitrary>], iteration_bounds = array<i64: 4, 1, 1>, scalar_prefetch = 0 : i64, scratch_operands = 3 : i64, tpu.core_type = #tpu.core_type<tc>, window_params = [{transform_indices = @transform_0, window_bounds = array<i64: 1, 8, 8>}, {transform_indices = @transform_1, window_bounds = array<i64: 1, 8, 8>}, {transform_indices = @transform_2, window_bounds = array<i64: 1, 8, 8>}, {transform_indices = @transform_3, window_bounds = array<i64: 1, 8, 8>}]} {
    %c0_i32 = arith.constant 0 : i32
    %0 = arith.cmpi eq, %arg2, %c0_i32 : i32
    %1 = arith.extui %0 : i1 to i32
    %c0_i32_0 = arith.constant 0 : i32
    %2 = arith.cmpi ne, %1, %c0_i32_0 : i32
    scf.if %2 {
      %cst = arith.constant -1.000000e+30 : f32
      %12 = vector.broadcast %cst : f32 to vector<8x1xf32>
      %c0 = arith.constant 0 : index
      %c0_5 = arith.constant 0 : index
      %13 = vector.load %arg7[%c0, %c0_5] : memref<8x1xf32, #tpu.memory_space<vmem>>, vector<8x1xf32>
      tpu.vector_store %arg7[%c0, %c0_5], %12 {strides = array<i32>} : memref<8x1xf32, #tpu.memory_space<vmem>>, vector<8x1xf32>,
      %cst_6 = arith.constant 0.000000e+00 : f32
      %14 = vector.broadcast %cst_6 : f32 to vector<8x1xf32>
      %c0_7 = arith.constant 0 : index
      %c0_8 = arith.constant 0 : index
      %15 = vector.load %arg8[%c0_7, %c0_8] : memref<8x1xf32, #tpu.memory_space<vmem>>, vector<8x1xf32>
      tpu.vector_store %arg8[%c0_7, %c0_8], %14 {strides = array<i32>} : memref<8x1xf32, #tpu.memory_space<vmem>>, vector<8x1xf32>,
      %cst_9 = arith.constant 0.000000e+00 : f32
      %16 = vector.broadcast %cst_9 : f32 to vector<8x8xf32>
      %c0_10 = arith.constant 0 : index
      %c0_11 = arith.constant 0 : index
      %17 = vector.load %arg9[%c0_10, %c0_11] : memref<8x8xf32, #tpu.memory_space<vmem>>, vector<8x8xf32>
      tpu.vector_store %arg9[%c0_10, %c0_11], %16 {strides = array<i32>} : memref<8x8xf32, #tpu.memory_space<vmem>>, vector<8x8xf32>,
    } else {
    }
    %c8_i32 = arith.constant 8 : i32
    %3 = arith.muli %arg2, %c8_i32 : i32
    %c8_i32_1 = arith.constant 8 : i32
    %4 = arith.muli %arg1, %c8_i32_1 : i32
    %c7_i32 = arith.constant 7 : i32
    %5 = arith.addi %4, %c7_i32 : i32
    %6 = arith.cmpi sle, %3, %5 : i32
    %7 = arith.extui %6 : i1 to i32
    %c0_i32_2 = arith.constant 0 : i32
    %8 = arith.cmpi ne, %7, %c0_i32_2 : i32
    scf.if %8 {
      %c0 = arith.constant 0 : index
      %c0_5 = arith.constant 0 : index
      %c0_6 = arith.constant 0 : index
      %12 = vector.load %arg3[%c0, %c0_5, %c0_6] : memref<1x8x8xbf16, #tpu.memory_space<vmem>>, vector<1x8x8xbf16>
      %13 = vector.shape_cast %12 : vector<1x8x8xbf16> to vector<8x8xbf16>
      %c0_7 = arith.constant 0 : index
      %c0_8 = arith.constant 0 : index
      %c0_9 = arith.constant 0 : index
      %14 = vector.load %arg4[%c0_7, %c0_8, %c0_9] : memref<1x8x8xbf16, #tpu.memory_space<vmem>>, vector<1x8x8xbf16>
      %15 = vector.shape_cast %14 : vector<1x8x8xbf16> to vector<8x8xbf16>
      %cst = arith.constant dense<0.000000e+00> : vector<8x8xf32>
      %16 = tpu.matmul %13, %15, %cst {dimension_numbers = #tpu.dot_dimension_numbers<[1], [1], [0], [0], [0, 0, 1, 0], [], []>} : vector<8x8xbf16>, vector<8x8xbf16>, vector<8x8xf32> -> vector<8x8xf32>
      %cst_10 = arith.constant 0.353553385 : f32
      %17 = vector.broadcast %cst_10 : f32 to vector<8x8xf32>
      %18 = arith.mulf %16, %17 : vector<8x8xf32>
      %c8_i32_11 = arith.constant 8 : i32
      %19 = arith.muli %arg1, %c8_i32_11 : i32
      %20 = tpu.iota {dimensions = array<i32: 0>} : vector<8x8xi32>
      %21 = vector.broadcast %19 : i32 to vector<8x8xi32>
      %22 = arith.addi %21, %20 : vector<8x8xi32>
      %c8_i32_12 = arith.constant 8 : i32
      %23 = arith.muli %arg2, %c8_i32_12 : i32
      %24 = tpu.iota {dimensions = array<i32: 1>} : vector<8x8xi32>
      %25 = vector.broadcast %23 : i32 to vector<8x8xi32>
      %26 = arith.addi %25, %24 : vector<8x8xi32>
      %27 = arith.cmpi sle, %26, %22 : vector<8x8xi32>
      %cst_13 = arith.constant -1.000000e+30 : f32
      %28 = vector.broadcast %cst_13 : f32 to vector<8x8xf32>
      %29 = arith.select %27, %18, %28 : vector<8x8xi1>, vector<8x8xf32>
      %c0_14 = arith.constant 0 : index
      %c0_15 = arith.constant 0 : index
      %30 = vector.load %arg7[%c0_14, %c0_15] : memref<8x1xf32, #tpu.memory_space<vmem>>, vector<8x1xf32>
      %cst_16 = arith.constant dense<0xFF800000> : vector<8xf32>
      %31 = vector.multi_reduction <maximumf>, %29, %cst_16 [1] : vector<8x8xf32> to vector<8xf32>
      %32 = vector.shape_cast %31 : vector<8xf32> to vector<8x1xf32>
      %33 = arith.maximumf %30, %32 : vector<8x1xf32>
      %34 = arith.subf %30, %33 : vector<8x1xf32>
      %35 = math.exp %34 : vector<8x1xf32>
      %36 = vector.broadcast %33 : vector<8x1xf32> to vector<8x8xf32>
      %37 = arith.subf %29, %36 : vector<8x8xf32>
      %38 = math.exp %37 : vector<8x8xf32>
      %c0_17 = arith.constant 0 : index
      %c0_18 = arith.constant 0 : index
      %39 = vector.load %arg8[%c0_17, %c0_18] : memref<8x1xf32, #tpu.memory_space<vmem>>, vector<8x1xf32>
      %40 = arith.mulf %35, %39 : vector<8x1xf32>
      %cst_19 = arith.constant dense<0.000000e+00> : vector<8xf32>
      %41 = vector.multi_reduction <add>, %38, %cst_19 [1] : vector<8x8xf32> to vector<8xf32>
      %42 = vector.shape_cast %41 : vector<8xf32> to vector<8x1xf32>
      %43 = arith.addf %40, %42 : vector<8x1xf32>
      %c0_20 = arith.constant 0 : index
      %c0_21 = arith.constant 0 : index
      %44 = vector.load %arg8[%c0_20, %c0_21] : memref<8x1xf32, #tpu.memory_space<vmem>>, vector<8x1xf32>
      tpu.vector_store %arg8[%c0_20, %c0_21], %43 {strides = array<i32>} : memref<8x1xf32, #tpu.memory_space<vmem>>, vector<8x1xf32>,
      %c0_22 = arith.constant 0 : index
      %c0_23 = arith.constant 0 : index
      %45 = vector.load %arg9[%c0_22, %c0_23] : memref<8x8xf32, #tpu.memory_space<vmem>>, vector<8x8xf32>
      %46 = vector.broadcast %35 : vector<8x1xf32> to vector<8x8xf32>
      %47 = arith.mulf %46, %45 : vector<8x8xf32>
      %48 = arith.truncf %38 : vector<8x8xf32> to vector<8x8xbf16>
      %c0_24 = arith.constant 0 : index
      %c0_25 = arith.constant 0 : index
      %c0_26 = arith.constant 0 : index
      %49 = vector.load %arg5[%c0_24, %c0_25, %c0_26] : memref<1x8x8xbf16, #tpu.memory_space<vmem>>, vector<1x8x8xbf16>
      %50 = vector.shape_cast %49 : vector<1x8x8xbf16> to vector<8x8xbf16>
      %cst_27 = arith.constant dense<0.000000e+00> : vector<8x8xf32>
      %51 = tpu.matmul %48, %50, %cst_27 {dimension_numbers = #tpu.dot_dimension_numbers<[1], [0], [0], [1], [0, 0, 1, 1], [], []>} : vector<8x8xbf16>, vector<8x8xbf16>, vector<8x8xf32> -> vector<8x8xf32>
      %52 = arith.addf %47, %51 : vector<8x8xf32>
      %c0_28 = arith.constant 0 : index
      %c0_29 = arith.constant 0 : index
      %53 = vector.load %arg9[%c0_28, %c0_29] : memref<8x8xf32, #tpu.memory_space<vmem>>, vector<8x8xf32>
      tpu.vector_store %arg9[%c0_28, %c0_29], %52 {strides = array<i32>} : memref<8x8xf32, #tpu.memory_space<vmem>>, vector<8x8xf32>,
      %c0_30 = arith.constant 0 : index
      %c0_31 = arith.constant 0 : index
      %54 = vector.load %arg7[%c0_30, %c0_31] : memref<8x1xf32, #tpu.memory_space<vmem>>, vector<8x1xf32>
      tpu.vector_store %arg7[%c0_30, %c0_31], %33 {strides = array<i32>} : memref<8x1xf32, #tpu.memory_space<vmem>>, vector<8x1xf32>,
    } else {
    }
    %c0_i32_3 = arith.constant 0 : i32
    %9 = arith.cmpi eq, %arg2, %c0_i32_3 : i32
    %10 = arith.extui %9 : i1 to i32
    %c0_i32_4 = arith.constant 0 : i32
    %11 = arith.cmpi ne, %10, %c0_i32_4 : i32
    scf.if %11 {
      %c0 = arith.constant 0 : index
      %c0_5 = arith.constant 0 : index
      %12 = vector.load %arg9[%c0, %c0_5] : memref<8x8xf32, #tpu.memory_space<vmem>>, vector<8x8xf32>
      %c0_6 = arith.constant 0 : index
      %c0_7 = arith.constant 0 : index
      %13 = vector.load %arg8[%c0_6, %c0_7] : memref<8x1xf32, #tpu.memory_space<vmem>>, vector<8x1xf32>
      %14 = tpu.reciprocal %13 {approx = true} : vector<8x1xf32> -> vector<8x1xf32>
      %15 = vector.broadcast %14 : vector<8x1xf32> to vector<8x8xf32>
      %16 = arith.mulf %12, %15 : vector<8x8xf32>
      %17 = arith.truncf %16 : vector<8x8xf32> to vector<8x8xbf16>
      %c0_8 = arith.constant 0 : index
      %c0_9 = arith.constant 0 : index
      %c0_10 = arith.constant 0 : index
      %18 = vector.load %arg6[%c0_8, %c0_9, %c0_10] : memref<1x8x8xbf16, #tpu.memory_space<vmem>>, vector<1x8x8xbf16>
      %19 = vector.shape_cast %18 : vector<1x8x8xbf16> to vector<8x8xbf16>
      %20 = vector.shape_cast %17 : vector<8x8xbf16> to vector<1x8x8xbf16>
      tpu.vector_store %arg6[%c0_8, %c0_9, %c0_10], %20 {strides = array<i32>} : memref<1x8x8xbf16, #tpu.memory_space<vmem>>, vector<1x8x8xbf16>,
    } else {
    }
    return
  }
  func.func @transform_0(%arg0: i32, %arg1: i32, %arg2: i32) -> (i32, i32, i32) {
    %c0_i32 = arith.constant 0 : i32
    %c0_i32_0 = arith.constant 0 : i32
    return %arg0, %arg1, %c0_i32 : i32, i32, i32
  }
  func.func @transform_1(%arg0: i32, %arg1: i32, %arg2: i32) -> (i32, i32, i32) {
    %c0_i32 = arith.constant 0 : i32
    %c0_i32_0 = arith.constant 0 : i32
    return %arg0, %arg2, %c0_i32 : i32, i32, i32
  }
  func.func @transform_2(%arg0: i32, %arg1: i32, %arg2: i32) -> (i32, i32, i32) {
    %c0_i32 = arith.constant 0 : i32
    %c0_i32_0 = arith.constant 0 : i32
    return %arg0, %arg2, %c0_i32 : i32, i32, i32
  }
  func.func @transform_3(%arg0: i32, %arg1: i32, %arg2: i32) -> (i32, i32, i32) {
    %c0_i32 = arith.constant 0 : i32
    %c0_i32_0 = arith.constant 0 : i32
    return %arg0, %arg1, %c0_i32 : i32, i32, i32
  }
}

module attributes {stable_mosaic.version = 11 : i64} {
  func.func @_mlp_kernel(%arg0: i32, %arg1: i32, %arg2: memref<8x32xbf16, #tpu.memory_space<vmem>>, %arg3: memref<1x32xf32, #tpu.memory_space<vmem>>, %arg4: memref<32x64xbf16, #tpu.memory_space<vmem>>, %arg5: memref<32x64xbf16, #tpu.memory_space<vmem>>, %arg6: memref<64x32xbf16, #tpu.memory_space<vmem>>, %arg7: memref<8x32xbf16, #tpu.memory_space<vmem>>, %arg8: memref<8x32xf32, #tpu.memory_space<vmem>>) attributes {dimension_semantics = [#tpu.dimension_semantics<parallel>, #tpu.dimension_semantics<arbitrary>], iteration_bounds = array<i64: 1, 1>, scalar_prefetch = 0 : i64, scratch_operands = 1 : i64, tpu.core_type = #tpu.core_type<tc>, window_params = [{transform_indices = @transform_0, window_bounds = array<i64: 8, 32>}, {pipeline_mode = #tpu.pipeline_mode<synchronous>, transform_indices = @transform_1, window_bounds = array<i64: 1, 32>}, {transform_indices = @transform_2, window_bounds = array<i64: 32, 64>}, {transform_indices = @transform_3, window_bounds = array<i64: 32, 64>}, {transform_indices = @transform_4, window_bounds = array<i64: 64, 32>}, {transform_indices = @transform_5, window_bounds = array<i64: 8, 32>}]} {
    %c0 = arith.constant 0 : index
    %c0_0 = arith.constant 0 : index
    %0 = vector.load %arg2[%c0, %c0_0] : memref<8x32xbf16, #tpu.memory_space<vmem>>, vector<8x32xbf16>
    %1 = arith.extf %0 : vector<8x32xbf16> to vector<8x32xf32>
    %c0_i32 = arith.constant 0 : i32
    %2 = arith.cmpi eq, %arg1, %c0_i32 : i32
    %3 = arith.extui %2 : i1 to i32
    %c0_i32_1 = arith.constant 0 : i32
    %4 = arith.cmpi ne, %3, %c0_i32_1 : i32
    scf.if %4 {
      %c0_22 = arith.constant 0 : index
      %c0_23 = arith.constant 0 : index
      %39 = vector.load %arg8[%c0_22, %c0_23] : memref<8x32xf32, #tpu.memory_space<vmem>>, vector<8x32xf32>
      tpu.vector_store %arg8[%c0_22, %c0_23], %1 {strides = array<i32>} : memref<8x32xf32, #tpu.memory_space<vmem>>, vector<8x32xf32>,
    } else {
    }
    %5 = arith.mulf %1, %1 : vector<8x32xf32>
    %cst = arith.constant dense<0.000000e+00> : vector<8xf32>
    %6 = vector.multi_reduction <add>, %5, %cst [1] : vector<8x32xf32> to vector<8xf32>
    %7 = vector.shape_cast %6 : vector<8xf32> to vector<8x1xf32>
    %cst_2 = arith.constant 3.200000e+01 : f32
    %8 = vector.broadcast %cst_2 : f32 to vector<8x1xf32>
    %9 = arith.divf %7, %8 : vector<8x1xf32>
    %cst_3 = arith.constant 9.99999974E-6 : f32
    %10 = vector.broadcast %cst_3 : f32 to vector<8x1xf32>
    %11 = arith.addf %9, %10 : vector<8x1xf32>
    %12 = math.rsqrt %11 : vector<8x1xf32>
    %13 = vector.broadcast %12 : vector<8x1xf32> to vector<8x32xf32>
    %14 = arith.mulf %1, %13 : vector<8x32xf32>
    %c0_4 = arith.constant 0 : index
    %c0_5 = arith.constant 0 : index
    %15 = vector.load %arg3[%c0_4, %c0_5] : memref<1x32xf32, #tpu.memory_space<vmem>>, vector<1x32xf32>
    %16 = vector.broadcast %15 : vector<1x32xf32> to vector<8x32xf32>
    %17 = arith.mulf %14, %16 : vector<8x32xf32>
    %18 = arith.truncf %17 : vector<8x32xf32> to vector<8x32xbf16>
    %c0_6 = arith.constant 0 : index
    %c0_7 = arith.constant 0 : index
    %19 = vector.load %arg4[%c0_6, %c0_7] : memref<32x64xbf16, #tpu.memory_space<vmem>>, vector<32x64xbf16>
    %cst_8 = arith.constant dense<0.000000e+00> : vector<8x64xf32>
    %20 = tpu.matmul %18, %19, %cst_8 {dimension_numbers = #tpu.dot_dimension_numbers<[1], [0], [0], [1], [0, 0, 1, 1], [], []>} : vector<8x32xbf16>, vector<32x64xbf16>, vector<8x64xf32> -> vector<8x64xf32>
    %c0_9 = arith.constant 0 : index
    %c0_10 = arith.constant 0 : index
    %21 = vector.load %arg5[%c0_9, %c0_10] : memref<32x64xbf16, #tpu.memory_space<vmem>>, vector<32x64xbf16>
    %cst_11 = arith.constant dense<0.000000e+00> : vector<8x64xf32>
    %22 = tpu.matmul %18, %21, %cst_11 {dimension_numbers = #tpu.dot_dimension_numbers<[1], [0], [0], [1], [0, 0, 1, 1], [], []>} : vector<8x32xbf16>, vector<32x64xbf16>, vector<8x64xf32> -> vector<8x64xf32>
    %23 = arith.negf %20 : vector<8x64xf32>
    %24 = math.exp %23 : vector<8x64xf32>
    %cst_12 = arith.constant 1.000000e+00 : f32
    %25 = vector.broadcast %cst_12 : f32 to vector<8x64xf32>
    %26 = arith.addf %25, %24 : vector<8x64xf32>
    %27 = arith.divf %25, %26 : vector<8x64xf32>
    %28 = arith.mulf %20, %27 : vector<8x64xf32>
    %29 = arith.mulf %28, %22 : vector<8x64xf32>
    %30 = arith.truncf %29 : vector<8x64xf32> to vector<8x64xbf16>
    %c0_13 = arith.constant 0 : index
    %c0_14 = arith.constant 0 : index
    %31 = vector.load %arg8[%c0_13, %c0_14] : memref<8x32xf32, #tpu.memory_space<vmem>>, vector<8x32xf32>
    %c0_15 = arith.constant 0 : index
    %c0_16 = arith.constant 0 : index
    %32 = vector.load %arg6[%c0_15, %c0_16] : memref<64x32xbf16, #tpu.memory_space<vmem>>, vector<64x32xbf16>
    %cst_17 = arith.constant dense<0.000000e+00> : vector<8x32xf32>
    %33 = tpu.matmul %30, %32, %cst_17 {dimension_numbers = #tpu.dot_dimension_numbers<[1], [0], [0], [1], [0, 0, 1, 1], [], []>} : vector<8x64xbf16>, vector<64x32xbf16>, vector<8x32xf32> -> vector<8x32xf32>
    %34 = arith.addf %31, %33 : vector<8x32xf32>
    %c0_18 = arith.constant 0 : index
    %c0_19 = arith.constant 0 : index
    %35 = vector.load %arg8[%c0_18, %c0_19] : memref<8x32xf32, #tpu.memory_space<vmem>>, vector<8x32xf32>
    tpu.vector_store %arg8[%c0_18, %c0_19], %34 {strides = array<i32>} : memref<8x32xf32, #tpu.memory_space<vmem>>, vector<8x32xf32>,
    %c0_i32_20 = arith.constant 0 : i32
    %36 = arith.cmpi eq, %arg1, %c0_i32_20 : i32
    %37 = arith.extui %36 : i1 to i32
    %c0_i32_21 = arith.constant 0 : i32
    %38 = arith.cmpi ne, %37, %c0_i32_21 : i32
    scf.if %38 {
      %c0_22 = arith.constant 0 : index
      %c0_23 = arith.constant 0 : index
      %39 = vector.load %arg8[%c0_22, %c0_23] : memref<8x32xf32, #tpu.memory_space<vmem>>, vector<8x32xf32>
      %40 = arith.truncf %39 : vector<8x32xf32> to vector<8x32xbf16>
      %c0_24 = arith.constant 0 : index
      %c0_25 = arith.constant 0 : index
      %41 = vector.load %arg7[%c0_24, %c0_25] : memref<8x32xbf16, #tpu.memory_space<vmem>>, vector<8x32xbf16>
      tpu.vector_store %arg7[%c0_24, %c0_25], %40 {strides = array<i32>} : memref<8x32xbf16, #tpu.memory_space<vmem>>, vector<8x32xbf16>,
    } else {
    }
    return
  }
  func.func @transform_0(%arg0: i32, %arg1: i32) -> (i32, i32) {
    %c0_i32 = arith.constant 0 : i32
    %c0_i32_0 = arith.constant 0 : i32
    return %arg0, %c0_i32 : i32, i32
  }
  func.func @transform_1(%arg0: i32, %arg1: i32) -> (i32, i32) {
    %c0_i32 = arith.constant 0 : i32
    %c0_i32_0 = arith.constant 0 : i32
    %c0_i32_1 = arith.constant 0 : i32
    return %c0_i32, %c0_i32_0 : i32, i32
  }
  func.func @transform_2(%arg0: i32, %arg1: i32) -> (i32, i32) {
    %c0_i32 = arith.constant 0 : i32
    %c0_i32_0 = arith.constant 0 : i32
    return %c0_i32, %arg1 : i32, i32
  }
  func.func @transform_3(%arg0: i32, %arg1: i32) -> (i32, i32) {
    %c0_i32 = arith.constant 0 : i32
    %c0_i32_0 = arith.constant 0 : i32
    return %c0_i32, %arg1 : i32, i32
  }
  func.func @transform_4(%arg0: i32, %arg1: i32) -> (i32, i32) {
    %c0_i32 = arith.constant 0 : i32
    %c0_i32_0 = arith.constant 0 : i32
    return %arg1, %c0_i32 : i32, i32
  }
  func.func @transform_5(%arg0: i32, %arg1: i32) -> (i32, i32) {
    %c0_i32 = arith.constant 0 : i32
    %c0_i32_0 = arith.constant 0 : i32
    return %arg0, %c0_i32 : i32, i32
  }
}

module attributes {stable_mosaic.version = 11 : i64} {
  func.func @_linear_kernel(%arg0: i32, %arg1: i32, %arg2: i32, %arg3: memref<8x32xbf16, #tpu.memory_space<vmem>>, %arg4: memref<32x128xbf16, #tpu.memory_space<vmem>>, %arg5: memref<8x128xbf16, #tpu.memory_space<vmem>>, %arg6: memref<8x128xf32, #tpu.memory_space<vmem>>) attributes {dimension_semantics = [#tpu.dimension_semantics<parallel>, #tpu.dimension_semantics<parallel>, #tpu.dimension_semantics<arbitrary>], iteration_bounds = array<i64: 1, 1, 1>, scalar_prefetch = 0 : i64, scratch_operands = 1 : i64, tpu.core_type = #tpu.core_type<tc>, window_params = [{transform_indices = @transform_0, window_bounds = array<i64: 8, 32>}, {transform_indices = @transform_1, window_bounds = array<i64: 32, 128>}, {transform_indices = @transform_2, window_bounds = array<i64: 8, 128>}]} {
    %c0_i32 = arith.constant 0 : i32
    %0 = arith.cmpi eq, %arg2, %c0_i32 : i32
    %1 = arith.extui %0 : i1 to i32
    %c0_i32_0 = arith.constant 0 : i32
    %2 = arith.cmpi ne, %1, %c0_i32_0 : i32
    scf.if %2 {
      %cst_10 = arith.constant 0.000000e+00 : f32
      %12 = vector.broadcast %cst_10 : f32 to vector<8x128xf32>
      %c0_11 = arith.constant 0 : index
      %c0_12 = arith.constant 0 : index
      %13 = vector.load %arg6[%c0_11, %c0_12] : memref<8x128xf32, #tpu.memory_space<vmem>>, vector<8x128xf32>
      tpu.vector_store %arg6[%c0_11, %c0_12], %12 {strides = array<i32>} : memref<8x128xf32, #tpu.memory_space<vmem>>, vector<8x128xf32>,
    } else {
    }
    %c0 = arith.constant 0 : index
    %c0_1 = arith.constant 0 : index
    %3 = vector.load %arg6[%c0, %c0_1] : memref<8x128xf32, #tpu.memory_space<vmem>>, vector<8x128xf32>
    %c0_2 = arith.constant 0 : index
    %c0_3 = arith.constant 0 : index
    %4 = vector.load %arg3[%c0_2, %c0_3] : memref<8x32xbf16, #tpu.memory_space<vmem>>, vector<8x32xbf16>
    %c0_4 = arith.constant 0 : index
    %c0_5 = arith.constant 0 : index
    %5 = vector.load %arg4[%c0_4, %c0_5] : memref<32x128xbf16, #tpu.memory_space<vmem>>, vector<32x128xbf16>
    %cst = arith.constant dense<0.000000e+00> : vector<8x128xf32>
    %6 = tpu.matmul %4, %5, %cst {dimension_numbers = #tpu.dot_dimension_numbers<[1], [0], [0], [1], [0, 0, 1, 1], [], []>} : vector<8x32xbf16>, vector<32x128xbf16>, vector<8x128xf32> -> vector<8x128xf32>
    %7 = arith.addf %3, %6 : vector<8x128xf32>
    %c0_6 = arith.constant 0 : index
    %c0_7 = arith.constant 0 : index
    %8 = vector.load %arg6[%c0_6, %c0_7] : memref<8x128xf32, #tpu.memory_space<vmem>>, vector<8x128xf32>
    tpu.vector_store %arg6[%c0_6, %c0_7], %7 {strides = array<i32>} : memref<8x128xf32, #tpu.memory_space<vmem>>, vector<8x128xf32>,
    %c0_i32_8 = arith.constant 0 : i32
    %9 = arith.cmpi eq, %arg2, %c0_i32_8 : i32
    %10 = arith.extui %9 : i1 to i32
    %c0_i32_9 = arith.constant 0 : i32
    %11 = arith.cmpi ne, %10, %c0_i32_9 : i32
    scf.if %11 {
      %c0_10 = arith.constant 0 : index
      %c0_11 = arith.constant 0 : index
      %12 = vector.load %arg6[%c0_10, %c0_11] : memref<8x128xf32, #tpu.memory_space<vmem>>, vector<8x128xf32>
      %13 = arith.truncf %12 : vector<8x128xf32> to vector<8x128xbf16>
      %c0_12 = arith.constant 0 : index
      %c0_13 = arith.constant 0 : index
      %14 = vector.load %arg5[%c0_12, %c0_13] : memref<8x128xbf16, #tpu.memory_space<vmem>>, vector<8x128xbf16>
      tpu.vector_store %arg5[%c0_12, %c0_13], %13 {strides = array<i32>} : memref<8x128xbf16, #tpu.memory_space<vmem>>, vector<8x128xbf16>,
    } else {
    }
    return
  }
  func.func @transform_0(%arg0: i32, %arg1: i32, %arg2: i32) -> (i32, i32) {
    %c0_i32 = arith.constant 0 : i32
    return %arg0, %arg2 : i32, i32
  }
  func.func @transform_1(%arg0: i32, %arg1: i32, %arg2: i32) -> (i32, i32) {
    %c0_i32 = arith.constant 0 : i32
    return %arg2, %arg1 : i32, i32
  }
  func.func @transform_2(%arg0: i32, %arg1: i32, %arg2: i32) -> (i32, i32) {
    %c0_i32 = arith.constant 0 : i32
    return %arg0, %arg1 : i32, i32
  }
}

module attributes {stable_mosaic.version = 11 : i64} {
  func.func @_rmsnorm_kernel(%arg0: i32, %arg1: memref<8x32xbf16, #tpu.memory_space<vmem>>, %arg2: memref<1x32xf32, #tpu.memory_space<vmem>>, %arg3: memref<8x32xbf16, #tpu.memory_space<vmem>>) attributes {dimension_semantics = [#tpu.dimension_semantics<parallel>], iteration_bounds = array<i64: 1>, scalar_prefetch = 0 : i64, scratch_operands = 0 : i64, tpu.core_type = #tpu.core_type<tc>, window_params = [{transform_indices = @transform_0, window_bounds = array<i64: 8, 32>}, {pipeline_mode = #tpu.pipeline_mode<synchronous>, transform_indices = @transform_1, window_bounds = array<i64: 1, 32>}, {transform_indices = @transform_2, window_bounds = array<i64: 8, 32>}]} {
    %c0 = arith.constant 0 : index
    %c0_0 = arith.constant 0 : index
    %0 = vector.load %arg1[%c0, %c0_0] : memref<8x32xbf16, #tpu.memory_space<vmem>>, vector<8x32xbf16>
    %1 = arith.extf %0 : vector<8x32xbf16> to vector<8x32xf32>
    %2 = arith.mulf %1, %1 : vector<8x32xf32>
    %cst = arith.constant dense<0.000000e+00> : vector<8xf32>
    %3 = vector.multi_reduction <add>, %2, %cst [1] : vector<8x32xf32> to vector<8xf32>
    %4 = vector.shape_cast %3 : vector<8xf32> to vector<8x1xf32>
    %cst_1 = arith.constant 3.200000e+01 : f32
    %5 = vector.broadcast %cst_1 : f32 to vector<8x1xf32>
    %6 = arith.divf %4, %5 : vector<8x1xf32>
    %cst_2 = arith.constant 9.99999974E-6 : f32
    %7 = vector.broadcast %cst_2 : f32 to vector<8x1xf32>
    %8 = arith.addf %6, %7 : vector<8x1xf32>
    %9 = math.rsqrt %8 : vector<8x1xf32>
    %10 = vector.broadcast %9 : vector<8x1xf32> to vector<8x32xf32>
    %11 = arith.mulf %1, %10 : vector<8x32xf32>
    %c0_3 = arith.constant 0 : index
    %c0_4 = arith.constant 0 : index
    %12 = vector.load %arg2[%c0_3, %c0_4] : memref<1x32xf32, #tpu.memory_space<vmem>>, vector<1x32xf32>
    %13 = vector.broadcast %12 : vector<1x32xf32> to vector<8x32xf32>
    %14 = arith.mulf %11, %13 : vector<8x32xf32>
    %15 = arith.truncf %14 : vector<8x32xf32> to vector<8x32xbf16>
    %c0_5 = arith.constant 0 : index
    %c0_6 = arith.constant 0 : index
    %16 = vector.load %arg3[%c0_5, %c0_6] : memref<8x32xbf16, #tpu.memory_space<vmem>>, vector<8x32xbf16>
    tpu.vector_store %arg3[%c0_5, %c0_6], %15 {strides = array<i32>} : memref<8x32xbf16, #tpu.memory_space<vmem>>, vector<8x32xbf16>,
    return
  }
  func.func @transform_0(%arg0: i32) -> (i32, i32) {
    %c0_i32 = arith.constant 0 : i32
    %c0_i32_0 = arith.constant 0 : i32
    return %arg0, %c0_i32 : i32, i32
  }
  func.func @transform_1(%arg0: i32) -> (i32, i32) {
    %c0_i32 = arith.constant 0 : i32
    %c0_i32_0 = arith.constant 0 : i32
    %c0_i32_1 = arith.constant 0 : i32
    return %c0_i32, %c0_i32_0 : i32, i32
  }
  func.func @transform_2(%arg0: i32) -> (i32, i32) {
    %c0_i32 = arith.constant 0 : i32
    %c0_i32_0 = arith.constant 0 : i32
    return %arg0, %c0_i32 : i32, i32
  }
}

module attributes {stable_mosaic.version = 11 : i64} {
  func.func @_linear_bias_kernel(%arg0: i32, %arg1: i32, %arg2: i32, %arg3: memref<8x64xbf16, #tpu.memory_space<vmem>>, %arg4: memref<64x32xbf16, #tpu.memory_space<vmem>>, %arg5: memref<1x32xf32, #tpu.memory_space<vmem>>, %arg6: memref<8x32xbf16, #tpu.memory_space<vmem>>, %arg7: memref<8x32xf32, #tpu.memory_space<vmem>>) attributes {dimension_semantics = [#tpu.dimension_semantics<parallel>, #tpu.dimension_semantics<parallel>, #tpu.dimension_semantics<arbitrary>], iteration_bounds = array<i64: 1, 1, 1>, scalar_prefetch = 0 : i64, scratch_operands = 1 : i64, tpu.core_type = #tpu.core_type<tc>, window_params = [{transform_indices = @transform_0, window_bounds = array<i64: 8, 64>}, {transform_indices = @transform_1, window_bounds = array<i64: 64, 32>}, {transform_indices = @transform_2, window_bounds = array<i64: 1, 32>}, {transform_indices = @transform_3, window_bounds = array<i64: 8, 32>}]} {
    %c0_i32 = arith.constant 0 : i32
    %0 = arith.cmpi eq, %arg2, %c0_i32 : i32
    %1 = arith.extui %0 : i1 to i32
    %c0_i32_0 = arith.constant 0 : i32
    %2 = arith.cmpi ne, %1, %c0_i32_0 : i32
    scf.if %2 {
      %cst_10 = arith.constant 0.000000e+00 : f32
      %12 = vector.broadcast %cst_10 : f32 to vector<8x32xf32>
      %c0_11 = arith.constant 0 : index
      %c0_12 = arith.constant 0 : index
      %13 = vector.load %arg7[%c0_11, %c0_12] : memref<8x32xf32, #tpu.memory_space<vmem>>, vector<8x32xf32>
      tpu.vector_store %arg7[%c0_11, %c0_12], %12 {strides = array<i32>} : memref<8x32xf32, #tpu.memory_space<vmem>>, vector<8x32xf32>,
    } else {
    }
    %c0 = arith.constant 0 : index
    %c0_1 = arith.constant 0 : index
    %3 = vector.load %arg7[%c0, %c0_1] : memref<8x32xf32, #tpu.memory_space<vmem>>, vector<8x32xf32>
    %c0_2 = arith.constant 0 : index
    %c0_3 = arith.constant 0 : index
    %4 = vector.load %arg3[%c0_2, %c0_3] : memref<8x64xbf16, #tpu.memory_space<vmem>>, vector<8x64xbf16>
    %c0_4 = arith.constant 0 : index
    %c0_5 = arith.constant 0 : index
    %5 = vector.load %arg4[%c0_4, %c0_5] : memref<64x32xbf16, #tpu.memory_space<vmem>>, vector<64x32xbf16>
    %cst = arith.constant dense<0.000000e+00> : vector<8x32xf32>
    %6 = tpu.matmul %4, %5, %cst {dimension_numbers = #tpu.dot_dimension_numbers<[1], [0], [0], [1], [0, 0, 1, 1], [], []>} : vector<8x64xbf16>, vector<64x32xbf16>, vector<8x32xf32> -> vector<8x32xf32>
    %7 = arith.addf %3, %6 : vector<8x32xf32>
    %c0_6 = arith.constant 0 : index
    %c0_7 = arith.constant 0 : index
    %8 = vector.load %arg7[%c0_6, %c0_7] : memref<8x32xf32, #tpu.memory_space<vmem>>, vector<8x32xf32>
    tpu.vector_store %arg7[%c0_6, %c0_7], %7 {strides = array<i32>} : memref<8x32xf32, #tpu.memory_space<vmem>>, vector<8x32xf32>,
    %c0_i32_8 = arith.constant 0 : i32
    %9 = arith.cmpi eq, %arg2, %c0_i32_8 : i32
    %10 = arith.extui %9 : i1 to i32
    %c0_i32_9 = arith.constant 0 : i32
    %11 = arith.cmpi ne, %10, %c0_i32_9 : i32
    scf.if %11 {
      %c0_10 = arith.constant 0 : index
      %c0_11 = arith.constant 0 : index
      %12 = vector.load %arg7[%c0_10, %c0_11] : memref<8x32xf32, #tpu.memory_space<vmem>>, vector<8x32xf32>
      %c0_12 = arith.constant 0 : index
      %c0_13 = arith.constant 0 : index
      %13 = vector.load %arg5[%c0_12, %c0_13] : memref<1x32xf32, #tpu.memory_space<vmem>>, vector<1x32xf32>
      %14 = vector.broadcast %13 : vector<1x32xf32> to vector<8x32xf32>
      %15 = arith.addf %12, %14 : vector<8x32xf32>
      %16 = arith.truncf %15 : vector<8x32xf32> to vector<8x32xbf16>
      %c0_14 = arith.constant 0 : index
      %c0_15 = arith.constant 0 : index
      %17 = vector.load %arg6[%c0_14, %c0_15] : memref<8x32xbf16, #tpu.memory_space<vmem>>, vector<8x32xbf16>
      tpu.vector_store %arg6[%c0_14, %c0_15], %16 {strides = array<i32>} : memref<8x32xbf16, #tpu.memory_space<vmem>>, vector<8x32xbf16>,
    } else {
    }
    return
  }
  func.func @transform_0(%arg0: i32, %arg1: i32, %arg2: i32) -> (i32, i32) {
    %c0_i32 = arith.constant 0 : i32
    return %arg0, %arg2 : i32, i32
  }
  func.func @transform_1(%arg0: i32, %arg1: i32, %arg2: i32) -> (i32, i32) {
    %c0_i32 = arith.constant 0 : i32
    return %arg2, %arg1 : i32, i32
  }
  func.func @transform_2(%arg0: i32, %arg1: i32, %arg2: i32) -> (i32, i32) {
    %c0_i32 = arith.constant 0 : i32
    %c0_i32_0 = arith.constant 0 : i32
    return %c0_i32, %arg1 : i32, i32
  }
  func.func @transform_3(%arg0: i32, %arg1: i32, %arg2: i32) -> (i32, i32) {
    %c0_i32 = arith.constant 0 : i32
    return %arg0, %arg1 : i32, i32
  }
}

module attributes {stable_mosaic.version = 11 : i64} {
  func.func @_linear_kernel(%arg0: i32, %arg1: i32, %arg2: i32, %arg3: memref<1x32xbf16, #tpu.memory_space<vmem>>, %arg4: memref<32x128xbf16, #tpu.memory_space<vmem>>, %arg5: memref<1x128xbf16, #tpu.memory_space<vmem>>, %arg6: memref<1x128xf32, #tpu.memory_space<vmem>>) attributes {dimension_semantics = [#tpu.dimension_semantics<parallel>, #tpu.dimension_semantics<parallel>, #tpu.dimension_semantics<arbitrary>], iteration_bounds = array<i64: 1, 1, 1>, scalar_prefetch = 0 : i64, scratch_operands = 1 : i64, tpu.core_type = #tpu.core_type<tc>, window_params = [{transform_indices = @transform_0, window_bounds = array<i64: 1, 32>}, {transform_indices = @transform_1, window_bounds = array<i64: 32, 128>}, {transform_indices = @transform_2, window_bounds = array<i64: 1, 128>}]} {
    %c0_i32 = arith.constant 0 : i32
    %0 = arith.cmpi eq, %arg2, %c0_i32 : i32
    %1 = arith.extui %0 : i1 to i32
    %c0_i32_0 = arith.constant 0 : i32
    %2 = arith.cmpi ne, %1, %c0_i32_0 : i32
    scf.if %2 {
      %cst_10 = arith.constant 0.000000e+00 : f32
      %12 = vector.broadcast %cst_10 : f32 to vector<1x128xf32>
      %c0_11 = arith.constant 0 : index
      %c0_12 = arith.constant 0 : index
      %13 = vector.load %arg6[%c0_11, %c0_12] : memref<1x128xf32, #tpu.memory_space<vmem>>, vector<1x128xf32>
      tpu.vector_store %arg6[%c0_11, %c0_12], %12 {strides = array<i32>} : memref<1x128xf32, #tpu.memory_space<vmem>>, vector<1x128xf32>,
    } else {
    }
    %c0 = arith.constant 0 : index
    %c0_1 = arith.constant 0 : index
    %3 = vector.load %arg6[%c0, %c0_1] : memref<1x128xf32, #tpu.memory_space<vmem>>, vector<1x128xf32>
    %c0_2 = arith.constant 0 : index
    %c0_3 = arith.constant 0 : index
    %4 = vector.load %arg3[%c0_2, %c0_3] : memref<1x32xbf16, #tpu.memory_space<vmem>>, vector<1x32xbf16>
    %c0_4 = arith.constant 0 : index
    %c0_5 = arith.constant 0 : index
    %5 = vector.load %arg4[%c0_4, %c0_5] : memref<32x128xbf16, #tpu.memory_space<vmem>>, vector<32x128xbf16>
    %cst = arith.constant dense<0.000000e+00> : vector<1x128xf32>
    %6 = tpu.matmul %4, %5, %cst {dimension_numbers = #tpu.dot_dimension_numbers<[1], [0], [0], [1], [0, 0, 1, 1], [], []>} : vector<1x32xbf16>, vector<32x128xbf16>, vector<1x128xf32> -> vector<1x128xf32>
    %7 = arith.addf %3, %6 : vector<1x128xf32>
    %c0_6 = arith.constant 0 : index
    %c0_7 = arith.constant 0 : index
    %8 = vector.load %arg6[%c0_6, %c0_7] : memref<1x128xf32, #tpu.memory_space<vmem>>, vector<1x128xf32>
    tpu.vector_store %arg6[%c0_6, %c0_7], %7 {strides = array<i32>} : memref<1x128xf32, #tpu.memory_space<vmem>>, vector<1x128xf32>,
    %c0_i32_8 = arith.constant 0 : i32
    %9 = arith.cmpi eq, %arg2, %c0_i32_8 : i32
    %10 = arith.extui %9 : i1 to i32
    %c0_i32_9 = arith.constant 0 : i32
    %11 = arith.cmpi ne, %10, %c0_i32_9 : i32
    scf.if %11 {
      %c0_10 = arith.constant 0 : index
      %c0_11 = arith.constant 0 : index
      %12 = vector.load %arg6[%c0_10, %c0_11] : memref<1x128xf32, #tpu.memory_space<vmem>>, vector<1x128xf32>
      %13 = arith.truncf %12 : vector<1x128xf32> to vector<1x128xbf16>
      %c0_12 = arith.constant 0 : index
      %c0_13 = arith.constant 0 : index
      %14 = vector.load %arg5[%c0_12, %c0_13] : memref<1x128xbf16, #tpu.memory_space<vmem>>, vector<1x128xbf16>
      tpu.vector_store %arg5[%c0_12, %c0_13], %13 {strides = array<i32>} : memref<1x128xbf16, #tpu.memory_space<vmem>>, vector<1x128xbf16>,
    } else {
    }
    return
  }
  func.func @transform_0(%arg0: i32, %arg1: i32, %arg2: i32) -> (i32, i32) {
    %c0_i32 = arith.constant 0 : i32
    return %arg0, %arg2 : i32, i32
  }
  func.func @transform_1(%arg0: i32, %arg1: i32, %arg2: i32) -> (i32, i32) {
    %c0_i32 = arith.constant 0 : i32
    return %arg2, %arg1 : i32, i32
  }
  func.func @transform_2(%arg0: i32, %arg1: i32, %arg2: i32) -> (i32, i32) {
    %c0_i32 = arith.constant 0 : i32
    return %arg0, %arg1 : i32, i32
  }
}

</mosaic_0001>

<bundles_post_ra>
// kernel: ea_model_forward.16
= control target key start
LH: loop header
LB: loop body
LE: loop exit
PB: predicated region body
PF: predicated region fallthrough
CT: control target
= control target key end

     0   :  { %vm18_vm0 = vcmask 261120   ;;  %v123_v4 = vmov 0.0   ;;  %vm124_vm1 = vmmov 0   ;;  %vm96_vm2 = vcmask 781312   ;;  %s162_s0 = inlined_call_operand.vmem [shape: bf16[8,32], index: 0, kind: input, shape index: {}]   ;;  %s163_s2 = inlined_call_operand.vmem [shape: bf16[32,96], index: 2, kind: input, shape index: {}]   ;;  %s164_s1 = inlined_call_operand.vmem [shape: f32[1,32], index: 1, kind: input, shape index: {}]   ;;  %s165_s3 = inlined_call_operand.vmem [shape: bf16[8,96], index: 3, kind: output, shape index: {}]  }
   0x1   :  { %v15_v0 = vld [vmem:[%s162_s0] sm:$0xf]  ;;  %109 = vmatprep.subr.bf16.mxu0 %v123_v4  ;;  %113 = vmatprep.mubr.msk.bf16.mxu0 %vm124_vm1, %v123_v4  ;;  %v120_v6 = vld [vmem:[%s163_s2 + $0x8] sm:$0xff]  }
   0x2   :  { %v16_v1 = vunpack.c.l.bf16 %v15_v0  ;;  %v119_v5 = vld [vmem:[%s163_s2] sm:$0xff]  }
   0x3   :  { %110 = vmatpush3.bf16.msra.mxu0 %v119_v5  ;;  %v102_v11 = vld [vmem:[%s164_s1] ss:$0 sm:$0xff] }
   0x4   :  { %v17_v2 = vmul.f32 %v16_v1, %v16_v1  ;;  %111 = vmatprep.subr.bf16.mxu0 %v123_v4 }
   0x6   :  { %v19_v3 = vsel %vm18_vm0, %v17_v2, 0.0 }
   0x7   :  { %20 = vadd.xlane.f32.xlu0 %v19_v3  ;;  %112 = vmatpush3.bf16.msra.mxu0 %v120_v6 }
  0x94   :  { %v21_v7 = vpop.xlane.xlu0 %20 }
  0x95   :  { %v23_v8 = vmul.f32 0.03125, %v21_v7 }
  0x97   :  { %v24_v9 = vadd.f32 1e-05, %v23_v8 }
  0x99   :  { %121 = vrsqrt.f32 %v24_v9 }
  0xa3   :  { %v122_v10 = vpop.eup %121 }
  0xa4   :  { %v26_v12 = vmul.f32 %v122_v10, %v16_v1 }
  0xa6   :  { %v34_v13 = vmul.f32 %v102_v11, %v26_v12 }
  0xa8   :  { %v35_v14 = vpack.c.bf16 %v34_v13, %v34_v13 }
  0xaa   :  { %114 = vmatmul.mubr.msk.bf16.vlgmr.msra.gmra.mrb[0].mxu0 %vm18_vm0, %v35_v14 }
 0x17d   :  { %v89_v15 = vpop.f32.mrb[0].mxu0 }
 0x17e   :  { %v95_v16 = vpack.c.bf16 %v89_v15, %v89_v15  ;;  %v115_v17 = vpop.f32.mrb[1].mxu0 }
 0x17f   :  { %v92_v18 = vpop.f32.mrb[2].mxu0 }
 0x180   :  { %97 = vst.msk [vmem:[%s165_s3] sm:$0xf] %vm96_vm2, %v95_v16  ;;  %v116_v19 = vpop.f32.mrb[3].mxu0 }

// kernel: ea_model_forward.18
= control target key start
LH: loop header
LB: loop body
LE: loop exit
PB: predicated region body
PF: predicated region fallthrough
CT: control target
= control target key end

     0   :  { %v104_v0 = vmov 0.0   ;;  %vm105_vm0 = vmmov 0   ;;  %vm32_vm1 = vcmask 261120   ;;  %vm80_vm2 = vcmask 257024   ;;  %s141_s1 = inlined_call_operand.vmem [shape: bf16[32,32], index: 1, kind: input, shape index: {}]   ;;  %s142_s0 = inlined_call_operand.vmem [shape: bf16[8,32], index: 0, kind: input, shape index: {}]   ;;  %s143_s2 = inlined_call_operand.vmem [shape: bf16[8,32], index: 2, kind: input, shape index: {}]   ;;  %s144_s3 = inlined_call_operand.vmem [shape: bf16[8,32], index: 3, kind: output, shape index: {}]  }
   0x1   :  { %92 = vmatprep.subr.bf16.mxu0 %v104_v0  ;;  %v102_v1 = vld [vmem:[%s141_s1] sm:$0xff]   ;;  %96 = vmatprep.mubr.msk.bf16.mxu0 %vm105_vm0, %v104_v0  ;;  %v103_v2 = vld [vmem:[%s141_s1 + $0x8] sm:$0xff]  }
   0x2   :  { %93 = vmatpush3.bf16.msra.mxu0 %v102_v1  ;;  %v15_v3 = vld [vmem:[%s142_s0] sm:$0xf] }
   0x3   :  { %94 = vmatprep.subr.bf16.mxu0 %v104_v0  ;;  %v76_v4 = vld [vmem:[%s143_s2] sm:$0xf] }
   0x4   :  { %v77_v5 = vunpack.c.l.bf16 %v76_v4 }
   0x6   :  { %95 = vmatpush3.bf16.msra.mxu0 %v103_v2 }
   0x9   :  { %97 = vmatmul.mubr.msk.bf16.vlgmr.msra.gmra.mrb[0].mxu0 %vm32_vm1, %v15_v3 }
  0xdc   :  { %v70_v6 = vpop.f32.mrb[0].mxu0 }
  0xdd   :  { %v78_v7 = vadd.f32 %v77_v5, %v70_v6  ;;  %v98_v8 = vpop.f32.mrb[1].mxu0 }
  0xde   :  { %v73_v9 = vpop.f32.mrb[2].mxu0 }
  0xdf   :  { %v79_v10 = vpack.c.bf16 %v78_v7, %v78_v7  ;;  %v99_v11 = vpop.f32.mrb[3].mxu0 }
  0xe1   :  { %81 = vst.msk [vmem:[%s144_s3] sm:$0xf] %vm80_vm2, %v79_v10 }

// kernel: ea_model_forward.17
= control target key start
LH: loop header
LB: loop body
LE: loop exit
PB: predicated region body
PF: predicated region fallthrough
CT: control target
= control target key end

     0   :  { %s655_s12 = smov 0   ;;  %s657_s13 = smov 0   ;;  %s711_s0 = inlined_call_operand.vmem [shape: bf16[4,8,8], index: 0, kind: input, shape index: {}]   ;;  %s712_s1 = inlined_call_operand.vmem [shape: bf16[4,8,8], index: 1, kind: input, shape index: {}]   ;;  %s713_s2 = inlined_call_operand.vmem [shape: bf16[4,8,8], index: 2, kind: input, shape index: {}]   ;;  %s714_s3 = inlined_call_operand.vmem [shape: bf16[4,8,8], index: 3, kind: output, shape index: {}]  }
   0x1   :  { %s659_s14 = smov 0  }
   0x2 LB: > { %s32_s15 = sadd.s32 1, %s625_s13  ;;  %p546_p0 = scmp.ge.s32.totalorder %s629_s14, 1  ;;  %s629_s14 = sphi %s659_s14, %s13_s14   ;;  %s625_s13 = sphi %s657_s13, %s716_s13   ;;  %s621_s12 = sphi %s655_s12, %s715_s12  }
   0x3   : > { %p34_p1 = scmp.ge.s32.totalorder %s32_s15, 4  ;;  %p190_p2 = scmp.lt.s32.totalorder %s629_s14, 5 }
   0x5   : > { %s718_s15 = smov (%p34_p1, %s32_s15), 0  ;;  %p191_p3 = pnand %p546_p0, %p190_p2 }
   0x6   : > { %p232_p4 = scmp.lt.s32.totalorder (!%p191_p3), %s621_s12, 3  ;;  %vm268_vm0 = vcmask (!%p191_p3), 64512   ;;  %v631_v0 = vmov (!%p191_p3), 0.0   ;;  %vm632_vm1 = vmmov (!%p191_p3), 0   ;;  %vm265_vm2 = vcmask (!%p191_p3), 7168  }
   0x7   : > { %194 = sbr.rel (%p191_p3) target bundleno = 826 (0x33a), region = 32  ;;  %559 = vmatprep.subr.bf16.mxu0 (!%p191_p3), %v631_v0  ;;  %269 = vst.msk [vmem:[#allocation4] sm:$0xff] (!%p191_p3), %vm268_vm0, %v631_v0  ;;  %561 = vmatprep.mubr.msk.bf16.mxu0 (!%p191_p3), %vm632_vm1, %v631_v0  ;;  %v633_v4 = vmov (!%p191_p3), -1e+30   ;;  %v327_v5 = vlaneseq (!%p191_p3)  ;;  %v634_v15 = vmov (!%p191_p3), 0   ;;  %vm373_vm4 = vcmask (!%p191_p3), 1043456  }
   0x8   : > { %565 = vmatprep.subr.bf16.mxu1 (!%p191_p3), %v631_v0  ;;  %567 = vmatprep.mubr.msk.bf16.mxu1 (!%p191_p3), %vm632_vm1, %v631_v0  ;;  %266 = vst.msk [vmem:[#allocation2] sm:$0xff] (!%p191_p3), %vm265_vm2, %v633_v4  ;;  %267 = vst.msk [vmem:[#allocation3] sm:$0xff] (!%p191_p3), %vm265_vm2, %v631_v0  ;;  %vm433_vm5 = vcmask (!%p191_p3), 60416  }
   0x9   : > { %v328_v6 = vshrl.u32 (!%p191_p3), %v327_v5, 7  ;;  %v332_v7 = vand.u32 (!%p191_p3), 127, %v327_v5  ;;  %599 = vset.pattern.permute.xlu0 (!%p191_p3), %v634_v15  ;;  %600 = vset.pattern.permute.xlu1 (!%p191_p3), %v634_v15 }
   0xb   : > { %vm335_vm3 = vcmp.le.s32.totalorder (!%p191_p3), %v332_v7, %v328_v6 }
   0xe   : > { %s720_s12 = smov (!%p232_p4, %s621_s12), 3  ;;  %v361_v36 = vld [vmem:[#allocation4] sm:$0xff] }
   0xf   : > { %s674_s16 = sshll.u32 %s720_s12, 2  ;;  %v337_v16 = vld [vmem:[#allocation2] sm:$0xff]  ;;  %v353_v30 = vld [vmem:[#allocation3] sm:$0xff] }
  0x10   : > { %s245_s19 = scalar_lea.vmem %s712_s1, %s674_s16  ;;  %s238_s22 = scalar_lea.vmem %s711_s0, %s674_s16 }
  0x11   : > { %v278_v1 = vld [vmem:[%s245_s19] sm:$0xf]  ;;  %s252_s25 = scalar_lea.vmem %s713_s2, %s674_s16  ;;  %s259_s28 = scalar_lea.vmem %s714_s3, %s674_s16 }
  0x12   : > { %v284_v2 = vsel %vm268_vm0, %v278_v1, 0  ;;  %v277_v3 = vld [vmem:[%s238_s22] sm:$0xf] }
  0x13   : > { %560 = vmatpush3.bf16.xpose.msra.mxu0 %v284_v2  ;;  %v369_v20 = vld [vmem:[%s252_s25] sm:$0xf] }
  0x14   : > { %v375_v21 = vsel %vm373_vm4, %v369_v20, 0 }
  0x15   : > { %566 = vmatpush3.bf16.msra.mxu1 %v375_v21 }
  0x1a   : > { %562 = vmatmul.mubr.msk.bf16.vlgmr.msra.gmra.mrb[0].mxu0 %vm268_vm0, %v277_v3 }
  0xed   : > { %v320_v8 = vpop.f32.mrb[0].mxu0 }
  0xee   : > { %v326_v9 = vmul.f32 0.35355338, %v320_v8  ;;  %v563_v10 = vpop.f32.mrb[1].mxu0 }
  0xef   : > { %v323_v11 = vpop.f32.mrb[2].mxu0 }
  0xf0   : > { %v564_v12 = vpop.f32.mrb[3].mxu0  ;;  %v336_v13 = vsel %vm335_vm3, %v326_v9, -1e+30 }
  0xf1   : > { %v338_v14 = vsel %vm268_vm0, %v336_v13, -inf }
  0xf2   : > { %339 = vmax.xlane.f32.xlu0 %v338_v14 }
 0x17f   : > { %v340_v17 = vpop.xlane.xlu0 %339 }
 0x180   : > { %v341_v18 = vmax.f32 %v337_v16, %v340_v17 }
 0x182   : > { %v342_v19 = vsub.f32 %v337_v16, %v341_v18  ;;  %419 = vst.msk [vmem:[#allocation2] sm:$0xff] %vm265_vm2, %v341_v18  ;;  %347 = vperm.xlu0 %599, %v341_v18  }
 0x184   : > { %v343_v28 = vmul.f32 1.442695, %v342_v19 }
 0x201   : > { %v348_v22 = vpop.permute.xlu0 %347 }
 0x202   : > { %v350_v23 = vsub.f32 %v336_v13, %v348_v22 }
 0x204   : > { %v351_v24 = vmul.f32 1.442695, %v350_v23 }
 0x206   : > { %601 = vpow2.f32 %v351_v24 }
 0x207   : > { %603 = vpow2.f32 %v343_v28 }
 0x210   : > { %v602_v25 = vpop.eup %601 }
 0x211   : > { %v355_v26 = vsel %vm268_vm0, %v602_v25, 0.0  ;;  %v368_v27 = vpack.c.bf16 %v602_v25, %v602_v25  ;;  %v604_v29 = vpop.eup %603 }
 0x212   : > { %356 = vadd.xlane.f32.xlu1 %v355_v26  ;;  %v354_v31 = vmul.f32 %v604_v29, %v353_v30 }
 0x213   : > { %568 = vmatmul.mubr.msk.bf16.vlgmr.msra.gmra.mrb[0].mxu1 %vm268_vm0, %v368_v27 }
 0x223   : > { %364 = vperm.xlu1 %600, %v604_v29  }
 0x29f   : > { %v357_v32 = vpop.xlane.xlu1 %356 }
 0x2a0   : > { %v358_v33 = vadd.f32 %v357_v32, %v354_v31 }
 0x2a2   : > { %360 = vst.msk [vmem:[#allocation3] sm:$0xff] %vm265_vm2, %v358_v33 }
 0x2a3   : > { %v365_v37 = vpop.permute.xlu1 %364 }
 0x2a4   : > { %v367_v38 = vmul.f32 %v365_v37, %v361_v36 }
 0x2a9   : > { %v424_v34 = vld [vmem:[#allocation3] sm:$0xff] }
 0x2aa   : > { %605 = vrcp.f32 %v424_v34 }
 0x2b4   : > { %v606_v35 = vpop.eup %605 }
 0x2b5   : > { %428 = vperm.xlu1 %600, %v606_v35  }
 0x2e6   : > { %v411_v39 = vpop.f32.mrb[0].mxu1 }
 0x2e7   : > { %v417_v40 = vadd.f32 %v411_v39, %v367_v38  ;;  %v569_v41 = vpop.f32.mrb[1].mxu1 }
 0x2e8   : > { %v414_v42 = vpop.f32.mrb[2].mxu1 }
 0x2e9   : > { %418 = vst.msk [vmem:[#allocation4] sm:$0xff] %vm268_vm0, %v417_v40  ;;  %v570_v43 = vpop.f32.mrb[3].mxu1 }
 0x2f0   : > { %v423_v44 = vld [vmem:[#allocation4] sm:$0xff] }
 0x334   : > { %v429_v45 = vpop.permute.xlu1 %428 }
 0x335   : > { %v431_v46 = vmul.f32 %v429_v45, %v423_v44 }
 0x337   : > { %v432_v47 = vpack.c.bf16 %v431_v46, %v431_v46 }
 0x339   : > { %434 = vst.msk [vmem:[%s259_s28] sm:$0xf] %vm433_vm5, %v432_v47 }
 0x33a PF: > { %s13_s14 = sadd.s32 1, %s629_s14   ;;  %s715_s12 = smov %s625_s13 }
 0x33b   : > { %p10_p5 = scmp.ge.s32.totalorder %s13_s14, 6   ;;  %s716_s13 = smov %s718_s15 }
 0x33d   :  { %12 = sbr.rel (!%p10_p5) target bundleno = 2 (0x2), region = 80 }

// kernel: ea_model_forward.19
= control target key start
LH: loop header
LB: loop body
LE: loop exit
PB: predicated region body
PF: predicated region fallthrough
CT: control target
= control target key end

     0   :  { %vm27_vm0 = vcmask 261120   ;;  %v330_v4 = vmov 0.0   ;;  %vm331_vm1 = vmmov 0   ;;  %vm205_vm2 = vcmask 523264   ;;  %s403_s0 = inlined_call_operand.vmem [shape: bf16[8,32], index: 0, kind: input, shape index: {}]   ;;  %s404_s2 = inlined_call_operand.vmem [shape: bf16[32,64], index: 2, kind: input, shape index: {}]   ;;  %s405_s3 = inlined_call_operand.vmem [shape: bf16[32,64], index: 3, kind: input, shape index: {}]   ;;  %s406_s1 = inlined_call_operand.vmem [shape: f32[1,32], index: 1, kind: input, shape index: {}]   ;;  %s407_s4 = inlined_call_operand.vmem [shape: bf16[64,32], index: 4, kind: input, shape index: {}]   ;;  %s408_s5 = inlined_call_operand.vmem [shape: bf16[8,32], index: 5, kind: output, shape index: {}]  }
   0x1   :  { %v21_v0 = vld [vmem:[%s403_s0] sm:$0xf]  ;;  %286 = vmatprep.subr.bf16.mxu1 %v330_v4  ;;  %290 = vmatprep.mubr.msk.bf16.mxu1 %vm331_vm1, %v330_v4  ;;  %v317_v6 = vld [vmem:[%s404_s2 + $0x8] sm:$0xff]   ;;  %v322_v19 = vld [vmem:[%s407_s4 + $0x10] sm:$0xff]   ;;  %vm256_vm3 = vcmask 257024  }
   0x2   :  { %v22_v1 = vunpack.c.l.bf16 %v21_v0  ;;  %v316_v5 = vld [vmem:[%s404_s2] sm:$0xff]   ;;  %302 = vmatprep.subr.bf16.mxu0 %v330_v4  ;;  %310 = vmatprep.mubr.msk.bf16.mxu0 %vm331_vm1, %v330_v4  ;;  %v319_v16 = vld [vmem:[%s405_s3 + $0x8] sm:$0xff]   ;;  %v323_v20 = vld [vmem:[%s407_s4 + $0x18] sm:$0xff]  }
   0x3   :  { %287 = vmatpush3.bf16.msra.mxu1 %v316_v5  ;;  %v262_v11 = vld [vmem:[%s406_s1] ss:$0 sm:$0xff]  ;;  %v321_v18 = vld [vmem:[%s407_s4 + $0x8] sm:$0xff]  }
   0x4   :  { %v29_v2 = vmul.f32 %v22_v1, %v22_v1  ;;  %28 = vst.msk [vmem:[#allocation2] sm:$0xff] %vm27_vm0, %v22_v1  ;;  %288 = vmatprep.subr.bf16.mxu1 %v330_v4  ;;  %v318_v14 = vld [vmem:[%s405_s3] sm:$0xff]  }
   0x5   :  { %v320_v17 = vld [vmem:[%s407_s4] sm:$0xff]  }
   0x6   :  { %v31_v3 = vsel %vm27_vm0, %v29_v2, 0.0  ;;  %303 = vmatpush3.bf16.msra.mxu0 %v320_v17 }
   0x7   :  { %32 = vadd.xlane.f32.xlu0 %v31_v3  ;;  %289 = vmatpush3.bf16.msra.mxu1 %v317_v6 }
   0x8   :  { %294 = vmatprep.subr.bf16.mxu1 %v330_v4  ;;  %304 = vmatprep.subr.bf16.mxu0 %v330_v4 }
   0xa   :  { %305 = vmatpush3.bf16.msra.mxu0 %v321_v18 }
   0xb   :  { %306 = vmatprep.subr.bf16.mxu0 %v330_v4  ;;  %v172_v36 = vld [vmem:[#allocation2] sm:$0xff] }
   0xe   :  { %307 = vmatpush3.bf16.msra.mxu0 %v322_v19 }
   0xf   :  { %308 = vmatprep.subr.bf16.mxu0 %v330_v4 }
  0x12   :  { %309 = vmatpush3.bf16.msra.mxu0 %v323_v20 }
  0x94   :  { %v33_v7 = vpop.xlane.xlu0 %32 }
  0x95   :  { %v35_v8 = vmul.f32 0.03125, %v33_v7 }
  0x97   :  { %v36_v9 = vadd.f32 1e-05, %v35_v8 }
  0x99   :  { %324 = vrsqrt.f32 %v36_v9 }
  0xa3   :  { %v325_v10 = vpop.eup %324 }
  0xa4   :  { %v38_v12 = vmul.f32 %v325_v10, %v22_v1 }
  0xa6   :  { %v46_v13 = vmul.f32 %v262_v11, %v38_v12 }
  0xa8   :  { %v47_v15 = vpack.c.bf16 %v46_v13, %v46_v13 }
  0xaa   :  { %291 = vmatmul.mubr.msk.bf16.vlgmr.msra.gmra.mrb[0].mxu1 %vm27_vm0, %v47_v15 }
  0xab   :  { %295 = vmatpush3.bf16.msra.mxu1 %v318_v14  ;;  %298 = vmatprep.mubr.msk.bf16.mxu1 %vm331_vm1, %v330_v4 }
  0xac   :  { %296 = vmatprep.subr.bf16.mxu1 %v330_v4 }
  0xaf   :  { %297 = vmatpush3.bf16.msra.mxu1 %v319_v16 }
  0xb2   :  { %299 = vmatmul.mubr.msk.bf16.vlgmr.msra.gmra.mrb[4].mxu1 %vm27_vm0, %v47_v15 }
 0x17d   :  { %v101_v21 = vpop.f32.mrb[0].mxu1 }
 0x17e   :  { %v269_v22 = vmul.f32 -1.442695, %v101_v21  ;;  %v292_v23 = vpop.f32.mrb[1].mxu1 }
 0x17f   :  { %v104_v24 = vpop.f32.mrb[2].mxu1 }
 0x180   :  { %326 = vpow2.f32 %v269_v22  ;;  %v293_v25 = vpop.f32.mrb[3].mxu1 }
 0x185   :  { %v157_v26 = vpop.f32.mrb[4].mxu1 }
 0x186   :  { %v300_v27 = vpop.f32.mrb[5].mxu1 }
 0x187   :  { %v160_v28 = vpop.f32.mrb[6].mxu1 }
 0x188   :  { %v301_v29 = vpop.f32.mrb[7].mxu1 }
 0x18a   :  { %v327_v30 = vpop.eup %326 }
 0x18b   :  { %v166_v31 = vadd.f32 1.0, %v327_v30 }
 0x18d   :  { %328 = vrcp.f32 %v166_v31 }
 0x197   :  { %v329_v32 = vpop.eup %328 }
 0x198   :  { %v169_v33 = vmul.f32 %v329_v32, %v101_v21 }
 0x19a   :  { %v170_v34 = vmul.f32 %v169_v33, %v157_v26 }
 0x19c   :  { %v171_v35 = vpack.c.bf16 %v170_v34, %v170_v34 }
 0x19e   :  { %311 = vmatmul.mubr.msk.bf16.vlgmr.msra.gmra.mrb[0].mxu0 %vm205_vm2, %v171_v35 }
 0x271   :  { %v243_v37 = vpop.f32.mrb[0].mxu0 }
 0x272   :  { %v249_v38 = vadd.f32 %v243_v37, %v172_v36  ;;  %v312_v39 = vpop.f32.mrb[1].mxu0 }
 0x273   :  { %v246_v40 = vpop.f32.mrb[2].mxu0 }
 0x274   :  { %250 = vst.msk [vmem:[#allocation2] sm:$0xff] %vm27_vm0, %v249_v38  ;;  %v313_v41 = vpop.f32.mrb[3].mxu0 }
 0x27b   :  { %v254_v42 = vld [vmem:[#allocation2] sm:$0xff] }
 0x27c   :  { %v255_v43 = vpack.c.bf16 %v254_v42, %v254_v42 }
 0x27e   :  { %257 = vst.msk [vmem:[%s408_s5] sm:$0xf] %vm256_vm3, %v255_v43 }

// kernel: ea_model_forward.25
= control target key start
LH: loop header
LB: loop body
LE: loop exit
PB: predicated region body
PF: predicated region fallthrough
CT: control target
= control target key end

     0   :  { %v109_v0 = vmov 0.0   ;;  %vm110_vm0 = vmmov 0   ;;  %vm35_vm1 = vcmask 261120   ;;  %s138_s1 = inlined_call_operand.vmem [shape: bf16[32,128], index: 1, kind: input, shape index: {}]   ;;  %s139_s0 = inlined_call_operand.vmem [shape: bf16[8,32], index: 0, kind: input, shape index: {}]   ;;  %s140_s2 = inlined_call_operand.vmem [shape: bf16[8,128], index: 2, kind: output, shape index: {}]  }
   0x1   :  { %97 = vmatprep.subr.bf16.mxu0 %v109_v0  ;;  %v107_v1 = vld [vmem:[%s138_s1] sm:$0xff]   ;;  %101 = vmatprep.mubr.msk.bf16.mxu0 %vm110_vm0, %v109_v0  ;;  %v108_v2 = vld [vmem:[%s138_s1 + $0x8] sm:$0xff]  }
   0x2   :  { %98 = vmatpush3.bf16.msra.mxu0 %v107_v1  ;;  %v18_v3 = vld [vmem:[%s139_s0] sm:$0xf] }
   0x3   :  { %99 = vmatprep.subr.bf16.mxu0 %v109_v0 }
   0x6   :  { %100 = vmatpush3.bf16.msra.mxu0 %v108_v2 }
   0x9   :  { %102 = vmatmul.mubr.msk.bf16.vlgmr.msra.gmra.mrb[0].mxu0 %vm35_vm1, %v18_v3 }
  0xdc   :  { %v73_v4 = vpop.f32.mrb[0].mxu0 }
  0xdd   :  { %v85_v5 = vpack.c.bf16 %v73_v4, %v73_v4  ;;  %v103_v6 = vpop.f32.mrb[1].mxu0 }
  0xde   :  { %v76_v7 = vpop.f32.mrb[2].mxu0 }
  0xdf   :  { %86 = vst [vmem:[%s140_s2] sm:$0xf] %v85_v5  ;;  %v104_v8 = vpop.f32.mrb[3].mxu0 }

// kernel: ea_model_forward.24
= control target key start
LH: loop header
LB: loop body
LE: loop exit
PB: predicated region body
PF: predicated region fallthrough
CT: control target
= control target key end

     0   :  { %vm14_vm0 = vcmask 261120   ;;  %vm32_vm1 = vcmask 257024   ;;  %s65_s0 = inlined_call_operand.vmem [shape: bf16[8,32], index: 0, kind: input, shape index: {}]   ;;  %s66_s1 = inlined_call_operand.vmem [shape: f32[1,32], index: 1, kind: input, shape index: {}]   ;;  %s67_s2 = inlined_call_operand.vmem [shape: bf16[8,32], index: 2, kind: output, shape index: {}]  }
   0x1   :  { %v11_v0 = vld [vmem:[%s65_s0] sm:$0xf] }
   0x2   :  { %v12_v1 = vunpack.c.l.bf16 %v11_v0  ;;  %v38_v8 = vld [vmem:[%s66_s1] ss:$0 sm:$0xff] }
   0x4   :  { %v13_v2 = vmul.f32 %v12_v1, %v12_v1 }
   0x6   :  { %v15_v3 = vsel %vm14_vm0, %v13_v2, 0.0 }
   0x7   :  { %16 = vadd.xlane.f32.xlu0 %v15_v3 }
  0x94   :  { %v17_v4 = vpop.xlane.xlu0 %16 }
  0x95   :  { %v19_v5 = vmul.f32 0.03125, %v17_v4 }
  0x97   :  { %v20_v6 = vadd.f32 1e-05, %v19_v5 }
  0x99   :  { %39 = vrsqrt.f32 %v20_v6 }
  0xa3   :  { %v40_v7 = vpop.eup %39 }
  0xa4   :  { %v22_v9 = vmul.f32 %v40_v7, %v12_v1 }
  0xa6   :  { %v30_v10 = vmul.f32 %v38_v8, %v22_v9 }
  0xa8   :  { %v31_v11 = vpack.c.bf16 %v30_v10, %v30_v10 }
  0xaa   :  { %33 = vst.msk [vmem:[%s67_s2] sm:$0xf] %vm32_vm1, %v31_v11 }

// kernel: ea_model_forward.26
= control target key start
LH: loop header
LB: loop body
LE: loop exit
PB: predicated region body
PF: predicated region fallthrough
CT: control target
= control target key end

     0   :  { %vm19_vm0 = vcmask 261120   ;;  %v150_v0 = vmov 0.0   ;;  %vm151_vm1 = vmmov 0   ;;  %vm55_vm2 = vcmask 523264   ;;  %s195_s1 = inlined_call_operand.vmem [shape: bf16[64,32], index: 1, kind: input, shape index: {}]   ;;  %s196_s0 = inlined_call_operand.vmem [shape: bf16[8,64], index: 0, kind: input, shape index: {}]   ;;  %s197_s2 = inlined_call_operand.vmem [shape: f32[1,32], index: 2, kind: input, shape index: {}]   ;;  %s198_s3 = inlined_call_operand.vmem [shape: bf16[8,32], index: 3, kind: output, shape index: {}]  }
   0x1   :  { %132 = vmatprep.subr.bf16.mxu0 %v150_v0  ;;  %v146_v1 = vld [vmem:[%s195_s1] sm:$0xff]   ;;  %140 = vmatprep.mubr.msk.bf16.mxu0 %vm151_vm1, %v150_v0  ;;  %20 = vst.msk [vmem:[#allocation2] sm:$0xff] %vm19_vm0, %v150_v0  ;;  %v147_v2 = vld [vmem:[%s195_s1 + $0x8] sm:$0xff]   ;;  %v148_v3 = vld [vmem:[%s195_s1 + $0x10] sm:$0xff]   ;;  %vm115_vm3 = vcmask 257024  }
   0x2   :  { %133 = vmatpush3.bf16.msra.mxu0 %v146_v1  ;;  %v149_v4 = vld [vmem:[%s195_s1 + $0x18] sm:$0xff]   ;;  %v22_v5 = vld [vmem:[%s196_s0] sm:$0xf] }
   0x3   :  { %134 = vmatprep.subr.bf16.mxu0 %v150_v0  ;;  %v126_v12 = vld [vmem:[%s197_s2] ss:$0 sm:$0xff] }
   0x6   :  { %135 = vmatpush3.bf16.msra.mxu0 %v147_v2 }
   0x7   :  { %136 = vmatprep.subr.bf16.mxu0 %v150_v0 }
   0x8   :  { %v21_v6 = vld [vmem:[#allocation2] sm:$0xff] }
   0xa   :  { %137 = vmatpush3.bf16.msra.mxu0 %v148_v3 }
   0xb   :  { %138 = vmatprep.subr.bf16.mxu0 %v150_v0 }
   0xe   :  { %139 = vmatpush3.bf16.msra.mxu0 %v149_v4 }
  0x11   :  { %141 = vmatmul.mubr.msk.bf16.vlgmr.msra.gmra.mrb[0].mxu0 %vm55_vm2, %v22_v5 }
  0xe4   :  { %v93_v7 = vpop.f32.mrb[0].mxu0 }
  0xe5   :  { %v99_v8 = vadd.f32 %v93_v7, %v21_v6  ;;  %v142_v9 = vpop.f32.mrb[1].mxu0 }
  0xe6   :  { %v96_v10 = vpop.f32.mrb[2].mxu0 }
  0xe7   :  { %101 = vst.msk [vmem:[#allocation2] sm:$0xff] %vm19_vm0, %v99_v8  ;;  %v143_v11 = vpop.f32.mrb[3].mxu0 }
  0xee   :  { %v105_v13 = vld [vmem:[#allocation2] sm:$0xff] }
  0xef   :  { %v113_v14 = vadd.f32 %v126_v12, %v105_v13 }
  0xf1   :  { %v114_v15 = vpack.c.bf16 %v113_v14, %v113_v14 }
  0xf3   :  { %116 = vst.msk [vmem:[%s198_s3] sm:$0xf] %vm115_vm3, %v114_v15 }

// kernel: ea_model_forward.31
= control target key start
LH: loop header
LB: loop body
LE: loop exit
PB: predicated region body
PF: predicated region fallthrough
CT: control target
= control target key end

     0   :  { %v114_v0 = vmov 0.0   ;;  %vm115_vm0 = vmmov 0   ;;  %vm35_vm1 = vcmask 261120   ;;  %vm86_vm2 = vcmask 1040384   ;;  %s146_s1 = inlined_call_operand.vmem [shape: bf16[32,128], index: 1, kind: input, shape index: {}]   ;;  %s147_s0 = inlined_call_operand.vmem [shape: bf16[1,32], index: 0, kind: input, shape index: {}]   ;;  %s148_s2 = inlined_call_operand.vmem [shape: bf16[1,128], index: 2, kind: output, shape index: {}]  }
   0x1   :  { %102 = vmatprep.subr.bf16.mxu0 %v114_v0  ;;  %16 = vst [vmem:[#allocation2] sm:$0x1] %v114_v0  ;;  %v112_v1 = vld [vmem:[%s146_s1] sm:$0xff]   ;;  %106 = vmatprep.mubr.msk.bf16.mxu0 %vm115_vm0, %v114_v0  ;;  %v113_v2 = vld [vmem:[%s146_s1 + $0x8] sm:$0xff]   ;;  %vm87_vm3 = vsmask.f32 256 }
   0x2   :  { %103 = vmatpush3.bf16.msra.mxu0 %v112_v1  ;;  %v18_v3 = vld [vmem:[%s147_s0] sm:$0x1]  ;;  %vm88_vm4 = vmand %vm86_vm2, %vm87_vm3 }
   0x3   :  { %104 = vmatprep.subr.bf16.mxu0 %v114_v0  ;;  %v89_v11 = vld [vmem:[%s148_s2] sm:$0x1] }
   0x6   :  { %105 = vmatpush3.bf16.msra.mxu0 %v113_v2 }
   0x8   :  { %v17_v4 = vld [vmem:[#allocation2] sm:$0x1] }
   0x9   :  { %107 = vmatmul.mubr.msk.bf16.vlgmr.msra.gmra.mrb[0].mxu0 %vm35_vm1, %v18_v3 }
  0xdc   :  { %v73_v5 = vpop.f32.mrb[0].mxu0 }
  0xdd   :  { %v79_v6 = vadd.f32 %v73_v5, %v17_v4  ;;  %v108_v7 = vpop.f32.mrb[1].mxu0 }
  0xde   :  { %v76_v8 = vpop.f32.mrb[2].mxu0 }
  0xdf   :  { %80 = vst [vmem:[#allocation2] sm:$0x1] %v79_v6  ;;  %v109_v9 = vpop.f32.mrb[3].mxu0 }
  0xe6   :  { %v84_v10 = vld [vmem:[#allocation2] sm:$0x1] }
  0xe7   :  { %v85_v12 = vpack.c.bf16 %v84_v10, %v84_v10 }
  0xe9   :  { %v90_v13 = vsel %vm88_vm4, %v85_v12, %v89_v11 }
  0xea   :  { %91 = vst [vmem:[%s148_s2] sm:$0x1] %v90_v13 }

</bundles_post_ra>
